<compile_context>
chip_gen: v7x
topology: tpu7x:2x2x1
jax: 0.10.0
libtpu: 0.0.40
codegen_flags: <defaults>
</compile_context>

<pallas_src>
from functools import partial

import jax
import jax.numpy as jnp
import numpy as np
from jax import lax
from jax.experimental import pallas as pl
from jax.experimental.pallas import tpu as pltpu


def _attn_kernel(xw_ref, gbd_ref, wec_ref, bec_ref, wpr_ref, bpr_ref,
                 ab_ref, sc_ref, ex_ref, o_ref, *, TH, W, NH, NG):
    """One (batch, row-tile) per grid step.

    xw_ref : (1, 1, (TH+3)*(W+2), C1) bf16 — zero-padded, pre-flattened row window.
    gbd_ref: (1, EC, NH*NG)          bf16 — block-diagonal guide embedding (per batch).
    All compute is over-wide (L = TH*(W+2) rows); the wrapper drops the 2 pad cols/row.
    """
    C2 = wpr_ref.shape[2]
    HC = C2 // NH
    Wp = W + 2
    L = TH * Wp
    inv_sqrt_hc = 1.0 / float(HC) ** 0.5

    xflat = xw_ref[0, 0]                                   # ((TH+3)*Wp, C1) bf16
    center = xflat[Wp + 1:Wp + 1 + L, :]                   # center tap slab (L, C1)

    # ---- 1x1 "ec" conv (BN folded): embed = x @ Wec + bec.  (If c1 == ec the module
    #      has no ec conv; the wrapper passes identity weights / zero bias.) ----
    embed = (jnp.dot(center, wec_ref[...], preferred_element_type=jnp.float32)
             + bec_ref[...])                                # (L, EC) f32

    # ---- 3x3 proj conv (BN folded): 9 contiguous-slice matmuls, fused f32 accumulation.
    #      Tap (dy,dx) starts at flat offset dy*(W+2)+dx of the padded window. ----
    proj = (jnp.dot(center, wpr_ref[4], preferred_element_type=jnp.float32)
            + bpr_ref[...])                                 # (L, C2) f32
    for dy in range(3):
        for dx in range(3):
            if dy == 1 and dx == 1:
                continue
            off = dy * Wp + dx
            proj = proj + jnp.dot(xflat[off:off + L, :], wpr_ref[dy * 3 + dx],
                                  preferred_element_type=jnp.float32)

    # ---- max-sigmoid gate, all heads in ONE block-diagonal matmul. ----
    s = jnp.dot(embed.astype(jnp.bfloat16), gbd_ref[0],
                preferred_element_type=jnp.float32)         # (L, NH*NG)
    if NH == 1:
        aw = jnp.max(s, axis=-1, keepdims=True)             # (L, 1)
    else:
        aw = jnp.concatenate(
            [jnp.max(s[:, m * NG:(m + 1) * NG], axis=-1, keepdims=True)
             for m in range(NH)], axis=-1)                  # (L, NH)
    aw = aw * inv_sqrt_hc + ab_ref[...]
    aw = pl.reciprocal(1.0 + jnp.exp(-aw), approx=True) * sc_ref[...]   # EUP exp + rcp

    # Exact head->channel expansion via 0/1 matmul (keeps the store lane-dense).
    gate = jnp.dot(aw, ex_ref[...], precision=lax.Precision.HIGHEST,
                   preferred_element_type=jnp.float32)      # (L, C2)

    o_ref[0, 0] = (proj * gate).astype(o_ref.dtype)         # single full-width store


def max_sigmoid_attn_forward(x_nchw, guide, params, nh, tile_h=None):
    """x_nchw: (N, C1, H, W) f32, guide: (N, NG, GC) f32. Returns (N, C2, H, W) f32."""
    wgl, bgl, wec, bec, wproj9, bproj, ab, sc = params
    N, C1, H, W = x_nchw.shape
    EC = wec.shape[1]
    C2 = wproj9.shape[2]
    NG = guide.shape[1]
    HC = C2 // nh
    assert EC == C2 and C2 % nh == 0, "module requires ec == nh * (c2 // nh)"

    TH = H if tile_h is None else tile_h
    assert H % TH == 0
    T = H // TH
    Wp = W + 2
    P = (TH + 3) * Wp          # flattened padded rows per tile (1 halo row above, 2 below)
    L = TH * Wp                # over-wide output rows per tile

    # ---- layout plumbing (all host-side): NCHW -> NHWC (bf16), pad, overlapping row
    #      windows with halos, pre-flattened so the kernel never reshapes. ----
    x = jnp.transpose(x_nchw, (0, 2, 3, 1)).astype(jnp.bfloat16)       # (N, H, W, C1)
    xp = jnp.pad(x, ((0, 0), (1, 2), (1, 1), (0, 0)))                  # (N, H+3, W+2, C1)
    win = jnp.stack([xp[:, t * TH:t * TH + TH + 3] for t in range(T)], axis=1)
    xw = win.reshape(N, T, P, C1)                                      # (N, T, P, C1)

    # ---- guide linear hoisted out of the kernel; build the block-diagonal per-head
    #      guide embedding (EC, NH*NG): block m = g_emb[:, :, m-th head].T ----
    g = jnp.einsum('ngc,ec->nge', guide, wgl) + bgl                    # (N, NG, EC)
    g5 = g.reshape(N, NG, nh, HC)
    gbd = jnp.zeros((N, EC, nh * NG), jnp.float32)
    for m in range(nh):
        gbd = gbd.at[:, m * HC:(m + 1) * HC, m * NG:(m + 1) * NG].set(
            jnp.transpose(g5[:, :, m, :], (0, 2, 1)))
    gbd = gbd.astype(jnp.bfloat16)

    # head -> channel 0/1 expansion matrix (nh, C2)
    ex = jnp.repeat(jnp.eye(nh, dtype=jnp.float32), HC, axis=1)

    wec_b = wec.astype(jnp.bfloat16)
    wpr_b = wproj9.astype(jnp.bfloat16)

    kernel = partial(_attn_kernel, TH=TH, W=W, NH=nh, NG=NG)

    # NOTE: constant-index weight operands could be single-buffered
    # (pipeline_mode=pl.Buffered(1)) on VMEM-tight chips (v7x); left default for
    # portability — they are small relative to the explicit VMEM budget below.
    out = pl.pallas_call(
        kernel,
        out_shape=jax.ShapeDtypeStruct((N, T, L, C2), jnp.float32),
        grid_spec=pltpu.PrefetchScalarGridSpec(
            num_scalar_prefetch=0,
            grid=(N, T),
            in_specs=[
                pl.BlockSpec((1, 1, P, C1), lambda n, t: (n, t, 0, 0)),
                pl.BlockSpec((1, EC, nh * NG), lambda n, t: (n, 0, 0)),
                pl.BlockSpec((C1, EC), lambda n, t: (0, 0)),
                pl.BlockSpec((1, EC), lambda n, t: (0, 0)),
                pl.BlockSpec((9, C1, C2), lambda n, t: (0, 0, 0)),
                pl.BlockSpec((1, C2), lambda n, t: (0, 0)),
                pl.BlockSpec((1, nh), lambda n, t: (0, 0)),
                pl.BlockSpec((1, nh), lambda n, t: (0, 0)),
                pl.BlockSpec((nh, C2), lambda n, t: (0, 0)),
            ],
            out_specs=pl.BlockSpec((1, 1, L, C2), lambda n, t: (n, t, 0, 0)),
        ),
        compiler_params=pltpu.CompilerParams(
            dimension_semantics=("parallel", "parallel"),
            vmem_limit_bytes=48 * 1024 * 1024),
    )(xw, gbd, wec_b, bec, wpr_b, bproj, ab, sc, ex)

    # drop the 2 pad columns per row, back to NCHW
    out = out.reshape(N, T, TH, Wp, C2)[:, :, :, :W, :].reshape(N, H, W, C2)
    return jnp.transpose(out, (0, 3, 1, 2))


# ----------------------------- parameters (BN folded) -----------------------------

def _fold_conv_bn(key, cin, cout, ksize, eps=1e-3):
    """Synthetic Conv2d(k, bias=False) + BatchNorm2d(eps=1e-3) folded (eval mode)."""
    kw, kg, kb, km, kv = jax.random.split(key, 5)
    w = 0.1 * jax.random.normal(kw, (cout, cin, ksize, ksize), jnp.float32)
    gamma = 1.0 + 0.1 * jax.random.normal(kg, (cout,), jnp.float32)
    beta = 0.1 * jax.random.normal(kb, (cout,), jnp.float32)
    mean = 0.05 * jax.random.normal(km, (cout,), jnp.float32)
    var = 0.5 + jnp.abs(jax.random.normal(kv, (cout,), jnp.float32))
    s = gamma / jnp.sqrt(var + eps)
    return w * s[:, None, None, None], beta - mean * s          # (O,I,k,k), (O,)


def make_attn_params(key, c1, c2, nh, ec, gc):
    assert ec == c2 and c2 % nh == 0
    k_ec, k_pr, k_gl, k_b = jax.random.split(key, 4)

    # self.ec : Conv(c1, ec, k=1, act=False)   (present because c1 != ec in the test)
    w_ec, b_ec = _fold_conv_bn(k_ec, c1, ec, 1)
    wec = jnp.transpose(w_ec[:, :, 0, 0])                       # (c1, ec)
    bec = b_ec[None, :]                                         # (1, ec)

    # self.proj_conv : Conv(c1, c2, k=3, s=1, act=False)
    w_pr, b_pr = _fold_conv_bn(k_pr, c1, c2, 3)
    wproj9 = jnp.transpose(w_pr, (2, 3, 1, 0)).reshape(9, c1, c2)   # [dy*3+dx, cin, cout]
    bproj = b_pr[None, :]                                       # (1, c2)

    # self.gl : nn.Linear(gc, ec) — native (out, in) layout.
    kw, kb2 = jax.random.split(k_gl)
    wgl = 0.1 * jax.random.normal(kw, (ec, gc), jnp.float32)
    bgl = 0.1 * jax.random.normal(kb2, (ec,), jnp.float32)

    # self.bias (nh,) — random here so the add is exercised; scale=False -> ones.
    ab = 0.1 * jax.random.normal(k_b, (nh,), jnp.float32)[None, :]   # (1, nh)
    sc = jnp.ones((1, nh), jnp.float32)
    return (wgl, bgl, wec, bec, wproj9, bproj, ab, sc)


# --------------------------- pure-JAX reference (validation) ---------------------------

def attn_reference(x_nchw, guide, params, nh):
    wgl, bgl, wec, bec, wproj9, bproj, ab, sc = params
    N, C1, H, W = x_nchw.shape
    C2 = wproj9.shape[2]
    HC = C2 // nh
    hp = lax.Precision.HIGHEST

    g = jnp.einsum('ngc,ec->nge', guide, wgl, precision=hp) + bgl[None, None, :]
    x = jnp.transpose(x_nchw, (0, 2, 3, 1))                                 # NHWC
    embed = jnp.einsum('nhwc,ce->nhwe', x, wec, precision=hp) + bec[0]      # (N,H,W,EC)

    e5 = embed.reshape(N, H, W, nh, HC)
    g4 = g.reshape(N, -1, nh, HC)
    aw = jnp.einsum('nhwmc,ngmc->nmhwg', e5, g4, precision=hp)              # (N,nh,H,W,NG)
    aw = aw.max(axis=-1) / (HC ** 0.5)
    aw = aw + ab[0][None, :, None, None]
    aw = jax.nn.sigmoid(aw) * sc[0][None, :, None, None]                    # (N,nh,H,W)

    w_hwio = wproj9.reshape(3, 3, C1, C2)
    proj = lax.conv_general_dilated(x, w_hwio, (1, 1), 'SAME',
                                    dimension_numbers=('NHWC', 'HWIO', 'NHWC'),
                                    precision=hp) + bproj[0]
    out = proj.reshape(N, H, W, nh, HC) * jnp.transpose(aw, (0, 2, 3, 1))[..., None]
    out = out.reshape(N, H, W, C2)
    return jnp.transpose(out, (0, 3, 1, 2))


if __name__ == "__main__":
    key = jax.random.PRNGKey(0)
    kx, kg, kp = jax.random.split(key, 3)

    # Small shapes consistent with the module: ec must equal nh * (c2 // nh).
    N, C1, H, W = 2, 4, 16, 16
    C2, NH, GC, NG = 32, 2, 64, 8
    EC = C2

    x = jax.random.normal(kx, (N, C1, H, W), jnp.float32)
    guide = jax.random.normal(kg, (N, NG, GC), jnp.float32)
    params = make_attn_params(kp, C1, C2, NH, EC, GC)

    out = jax.block_until_ready(max_sigmoid_attn_forward(x, guide, params, NH, tile_h=8))
    ref = jax.block_until_ready(attn_reference(x, guide, params, NH))
    # bf16 MXU inputs (f32 accumulation) -> ~1e-2 tolerance vs the f32 reference.
    np.testing.assert_allclose(np.asarray(out), np.asarray(ref), rtol=2e-2, atol=2e-2)

    print("KERNEL_OK")
</pallas_src>

<mosaic_0001>
module attributes {stable_mosaic.version = 11 : i64} {
  func.func @_attn_kernel(%arg0: i32, %arg1: i32, %arg2: memref<1x1x198x4xbf16, #tpu.memory_space<vmem>>, %arg3: memref<1x32x16xbf16, #tpu.memory_space<vmem>>, %arg4: memref<4x32xbf16, #tpu.memory_space<vmem>>, %arg5: memref<1x32xf32, #tpu.memory_space<vmem>>, %arg6: memref<9x4x32xbf16, #tpu.memory_space<vmem>>, %arg7: memref<1x32xf32, #tpu.memory_space<vmem>>, %arg8: memref<1x2xf32, #tpu.memory_space<vmem>>, %arg9: memref<1x2xf32, #tpu.memory_space<vmem>>, %arg10: memref<2x32xf32, #tpu.memory_space<vmem>>, %arg11: memref<1x1x144x32xf32, #tpu.memory_space<vmem>>) attributes {dimension_semantics = [#tpu.dimension_semantics<parallel>, #tpu.dimension_semantics<parallel>], iteration_bounds = array<i64: 2, 2>, scalar_prefetch = 0 : i64, scratch_operands = 0 : i64, tpu.core_type = #tpu.core_type<tc>, window_params = [{transform_indices = @transform_0, window_bounds = array<i64: 1, 1, 198, 4>}, {transform_indices = @transform_1, window_bounds = array<i64: 1, 32, 16>}, {pipeline_mode = #tpu.pipeline_mode<synchronous>, transform_indices = @transform_2, window_bounds = array<i64: 4, 32>}, {pipeline_mode = #tpu.pipeline_mode<synchronous>, transform_indices = @transform_3, window_bounds = array<i64: 1, 32>}, {pipeline_mode = #tpu.pipeline_mode<synchronous>, transform_indices = @transform_4, window_bounds = array<i64: 9, 4, 32>}, {pipeline_mode = #tpu.pipeline_mode<synchronous>, transform_indices = @transform_5, window_bounds = array<i64: 1, 32>}, {pipeline_mode = #tpu.pipeline_mode<synchronous>, transform_indices = @transform_6, window_bounds = array<i64: 1, 2>}, {pipeline_mode = #tpu.pipeline_mode<synchronous>, transform_indices = @transform_7, window_bounds = array<i64: 1, 2>}, {pipeline_mode = #tpu.pipeline_mode<synchronous>, transform_indices = @transform_8, window_bounds = array<i64: 2, 32>}, {transform_indices = @transform_9, window_bounds = array<i64: 1, 1, 144, 32>}]} {
    %c0 = arith.constant 0 : index
    %c0_0 = arith.constant 0 : index
    %c0_1 = arith.constant 0 : index
    %c0_2 = arith.constant 0 : index
    %0 = vector.load %arg2[%c0, %c0_0, %c0_1, %c0_2] : memref<1x1x198x4xbf16, #tpu.memory_space<vmem>>, vector<1x1x198x4xbf16>
    %1 = vector.shape_cast %0 : vector<1x1x198x4xbf16> to vector<198x4xbf16>
    %2 = vector.extract_strided_slice %1 {offsets = [19, 0], sizes = [144, 4], strides = [1, 1]} : vector<198x4xbf16> to vector<144x4xbf16>
    %c0_3 = arith.constant 0 : index
    %c0_4 = arith.constant 0 : index
    %3 = vector.load %arg4[%c0_3, %c0_4] : memref<4x32xbf16, #tpu.memory_space<vmem>>, vector<4x32xbf16>
    %cst = arith.constant dense<0.000000e+00> : vector<144x32xf32>
    %4 = tpu.matmul %2, %3, %cst {dimension_numbers = #tpu.dot_dimension_numbers<[1], [0], [0], [1], [0, 0, 1, 1], [], []>} : vector<144x4xbf16>, vector<4x32xbf16>, vector<144x32xf32> -> vector<144x32xf32>
    %c0_5 = arith.constant 0 : index
    %c0_6 = arith.constant 0 : index
    %5 = vector.load %arg5[%c0_5, %c0_6] : memref<1x32xf32, #tpu.memory_space<vmem>>, vector<1x32xf32>
    %6 = vector.broadcast %5 : vector<1x32xf32> to vector<144x32xf32>
    %7 = arith.addf %4, %6 : vector<144x32xf32>
    %c4 = arith.constant 4 : index
    %c0_7 = arith.constant 0 : index
    %c0_8 = arith.constant 0 : index
    %8 = vector.load %arg6[%c4, %c0_7, %c0_8] : memref<9x4x32xbf16, #tpu.memory_space<vmem>>, vector<1x4x32xbf16>
    %9 = vector.shape_cast %8 : vector<1x4x32xbf16> to vector<4x32xbf16>
    %cst_9 = arith.constant dense<0.000000e+00> : vector<144x32xf32>
    %10 = tpu.matmul %2, %9, %cst_9 {dimension_numbers = #tpu.dot_dimension_numbers<[1], [0], [0], [1], [0, 0, 1, 1], [], []>} : vector<144x4xbf16>, vector<4x32xbf16>, vector<144x32xf32> -> vector<144x32xf32>
    %c0_10 = arith.constant 0 : index
    %c0_11 = arith.constant 0 : index
    %11 = vector.load %arg7[%c0_10, %c0_11] : memref<1x32xf32, #tpu.memory_space<vmem>>, vector<1x32xf32>
    %12 = vector.broadcast %11 : vector<1x32xf32> to vector<144x32xf32>
    %13 = arith.addf %10, %12 : vector<144x32xf32>
    %14 = vector.extract_strided_slice %1 {offsets = [0, 0], sizes = [144, 4], strides = [1, 1]} : vector<198x4xbf16> to vector<144x4xbf16>
    %c0_12 = arith.constant 0 : index
    %c0_13 = arith.constant 0 : index
    %c0_14 = arith.constant 0 : index
    %15 = vector.load %arg6[%c0_12, %c0_13, %c0_14] : memref<9x4x32xbf16, #tpu.memory_space<vmem>>, vector<1x4x32xbf16>
    %16 = vector.shape_cast %15 : vector<1x4x32xbf16> to vector<4x32xbf16>
    %cst_15 = arith.constant dense<0.000000e+00> : vector<144x32xf32>
    %17 = tpu.matmul %14, %16, %cst_15 {dimension_numbers = #tpu.dot_dimension_numbers<[1], [0], [0], [1], [0, 0, 1, 1], [], []>} : vector<144x4xbf16>, vector<4x32xbf16>, vector<144x32xf32> -> vector<144x32xf32>
    %18 = arith.addf %13, %17 : vector<144x32xf32>
    %19 = vector.extract_strided_slice %1 {offsets = [1, 0], sizes = [144, 4], strides = [1, 1]} : vector<198x4xbf16> to vector<144x4xbf16>
    %c1 = arith.constant 1 : index
    %c0_16 = arith.constant 0 : index
    %c0_17 = arith.constant 0 : index
    %20 = vector.load %arg6[%c1, %c0_16, %c0_17] : memref<9x4x32xbf16, #tpu.memory_space<vmem>>, vector<1x4x32xbf16>
    %21 = vector.shape_cast %20 : vector<1x4x32xbf16> to vector<4x32xbf16>
    %cst_18 = arith.constant dense<0.000000e+00> : vector<144x32xf32>
    %22 = tpu.matmul %19, %21, %cst_18 {dimension_numbers = #tpu.dot_dimension_numbers<[1], [0], [0], [1], [0, 0, 1, 1], [], []>} : vector<144x4xbf16>, vector<4x32xbf16>, vector<144x32xf32> -> vector<144x32xf32>
    %23 = arith.addf %18, %22 : vector<144x32xf32>
    %24 = vector.extract_strided_slice %1 {offsets = [2, 0], sizes = [144, 4], strides = [1, 1]} : vector<198x4xbf16> to vector<144x4xbf16>
    %c2 = arith.constant 2 : index
    %c0_19 = arith.constant 0 : index
    %c0_20 = arith.constant 0 : index
    %25 = vector.load %arg6[%c2, %c0_19, %c0_20] : memref<9x4x32xbf16, #tpu.memory_space<vmem>>, vector<1x4x32xbf16>
    %26 = vector.shape_cast %25 : vector<1x4x32xbf16> to vector<4x32xbf16>
    %cst_21 = arith.constant dense<0.000000e+00> : vector<144x32xf32>
    %27 = tpu.matmul %24, %26, %cst_21 {dimension_numbers = #tpu.dot_dimension_numbers<[1], [0], [0], [1], [0, 0, 1, 1], [], []>} : vector<144x4xbf16>, vector<4x32xbf16>, vector<144x32xf32> -> vector<144x32xf32>
    %28 = arith.addf %23, %27 : vector<144x32xf32>
    %29 = vector.extract_strided_slice %1 {offsets = [18, 0], sizes = [144, 4], strides = [1, 1]} : vector<198x4xbf16> to vector<144x4xbf16>
    %c3 = arith.constant 3 : index
    %c0_22 = arith.constant 0 : index
    %c0_23 = arith.constant 0 : index
    %30 = vector.load %arg6[%c3, %c0_22, %c0_23] : memref<9x4x32xbf16, #tpu.memory_space<vmem>>, vector<1x4x32xbf16>
    %31 = vector.shape_cast %30 : vector<1x4x32xbf16> to vector<4x32xbf16>
    %cst_24 = arith.constant dense<0.000000e+00> : vector<144x32xf32>
    %32 = tpu.matmul %29, %31, %cst_24 {dimension_numbers = #tpu.dot_dimension_numbers<[1], [0], [0], [1], [0, 0, 1, 1], [], []>} : vector<144x4xbf16>, vector<4x32xbf16>, vector<144x32xf32> -> vector<144x32xf32>
    %33 = arith.addf %28, %32 : vector<144x32xf32>
    %34 = vector.extract_strided_slice %1 {offsets = [20, 0], sizes = [144, 4], strides = [1, 1]} : vector<198x4xbf16> to vector<144x4xbf16>
    %c5 = arith.constant 5 : index
    %c0_25 = arith.constant 0 : index
    %c0_26 = arith.constant 0 : index
    %35 = vector.load %arg6[%c5, %c0_25, %c0_26] : memref<9x4x32xbf16, #tpu.memory_space<vmem>>, vector<1x4x32xbf16>
    %36 = vector.shape_cast %35 : vector<1x4x32xbf16> to vector<4x32xbf16>
    %cst_27 = arith.constant dense<0.000000e+00> : vector<144x32xf32>
    %37 = tpu.matmul %34, %36, %cst_27 {dimension_numbers = #tpu.dot_dimension_numbers<[1], [0], [0], [1], [0, 0, 1, 1], [], []>} : vector<144x4xbf16>, vector<4x32xbf16>, vector<144x32xf32> -> vector<144x32xf32>
    %38 = arith.addf %33, %37 : vector<144x32xf32>
    %39 = vector.extract_strided_slice %1 {offsets = [36, 0], sizes = [144, 4], strides = [1, 1]} : vector<198x4xbf16> to vector<144x4xbf16>
    %c6 = arith.constant 6 : index
    %c0_28 = arith.constant 0 : index
    %c0_29 = arith.constant 0 : index
    %40 = vector.load %arg6[%c6, %c0_28, %c0_29] : memref<9x4x32xbf16, #tpu.memory_space<vmem>>, vector<1x4x32xbf16>
    %41 = vector.shape_cast %40 : vector<1x4x32xbf16> to vector<4x32xbf16>
    %cst_30 = arith.constant dense<0.000000e+00> : vector<144x32xf32>
    %42 = tpu.matmul %39, %41, %cst_30 {dimension_numbers = #tpu.dot_dimension_numbers<[1], [0], [0], [1], [0, 0, 1, 1], [], []>} : vector<144x4xbf16>, vector<4x32xbf16>, vector<144x32xf32> -> vector<144x32xf32>
    %43 = arith.addf %38, %42 : vector<144x32xf32>
    %44 = vector.extract_strided_slice %1 {offsets = [37, 0], sizes = [144, 4], strides = [1, 1]} : vector<198x4xbf16> to vector<144x4xbf16>
    %c7 = arith.constant 7 : index
    %c0_31 = arith.constant 0 : index
    %c0_32 = arith.constant 0 : index
    %45 = vector.load %arg6[%c7, %c0_31, %c0_32] : memref<9x4x32xbf16, #tpu.memory_space<vmem>>, vector<1x4x32xbf16>
    %46 = vector.shape_cast %45 : vector<1x4x32xbf16> to vector<4x32xbf16>
    %cst_33 = arith.constant dense<0.000000e+00> : vector<144x32xf32>
    %47 = tpu.matmul %44, %46, %cst_33 {dimension_numbers = #tpu.dot_dimension_numbers<[1], [0], [0], [1], [0, 0, 1, 1], [], []>} : vector<144x4xbf16>, vector<4x32xbf16>, vector<144x32xf32> -> vector<144x32xf32>
    %48 = arith.addf %43, %47 : vector<144x32xf32>
    %49 = vector.extract_strided_slice %1 {offsets = [38, 0], sizes = [144, 4], strides = [1, 1]} : vector<198x4xbf16> to vector<144x4xbf16>
    %c8 = arith.constant 8 : index
    %c0_34 = arith.constant 0 : index
    %c0_35 = arith.constant 0 : index
    %50 = vector.load %arg6[%c8, %c0_34, %c0_35] : memref<9x4x32xbf16, #tpu.memory_space<vmem>>, vector<1x4x32xbf16>
    %51 = vector.shape_cast %50 : vector<1x4x32xbf16> to vector<4x32xbf16>
    %cst_36 = arith.constant dense<0.000000e+00> : vector<144x32xf32>
    %52 = tpu.matmul %49, %51, %cst_36 {dimension_numbers = #tpu.dot_dimension_numbers<[1], [0], [0], [1], [0, 0, 1, 1], [], []>} : vector<144x4xbf16>, vector<4x32xbf16>, vector<144x32xf32> -> vector<144x32xf32>
    %53 = arith.addf %48, %52 : vector<144x32xf32>
    %54 = arith.truncf %7 : vector<144x32xf32> to vector<144x32xbf16>
    %c0_37 = arith.constant 0 : index
    %c0_38 = arith.constant 0 : index
    %c0_39 = arith.constant 0 : index
    %55 = vector.load %arg3[%c0_37, %c0_38, %c0_39] : memref<1x32x16xbf16, #tpu.memory_space<vmem>>, vector<1x32x16xbf16>
    %56 = vector.shape_cast %55 : vector<1x32x16xbf16> to vector<32x16xbf16>
    %cst_40 = arith.constant dense<0.000000e+00> : vector<144x16xf32>
    %57 = tpu.matmul %54, %56, %cst_40 {dimension_numbers = #tpu.dot_dimension_numbers<[1], [0], [0], [1], [0, 0, 1, 1], [], []>} : vector<144x32xbf16>, vector<32x16xbf16>, vector<144x16xf32> -> vector<144x16xf32>
    %58 = vector.extract_strided_slice %57 {offsets = [0, 0], sizes = [144, 8], strides = [1, 1]} : vector<144x16xf32> to vector<144x8xf32>
    %cst_41 = arith.constant dense<0xFF800000> : vector<144xf32>
    %59 = vector.multi_reduction <maximumf>, %58, %cst_41 [1] : vector<144x8xf32> to vector<144xf32>
    %60 = vector.shape_cast %59 : vector<144xf32> to vector<144x1xf32>
    %61 = vector.extract_strided_slice %57 {offsets = [0, 8], sizes = [144, 8], strides = [1, 1]} : vector<144x16xf32> to vector<144x8xf32>
    %cst_42 = arith.constant dense<0xFF800000> : vector<144xf32>
    %62 = vector.multi_reduction <maximumf>, %61, %cst_42 [1] : vector<144x8xf32> to vector<144xf32>
    %63 = vector.shape_cast %62 : vector<144xf32> to vector<144x1xf32>
    %64 = tpu.concatenate %60, %63 in 1 : vector<144x1xf32>, vector<144x1xf32> -> vector<144x2xf32>
    %cst_43 = arith.constant 2.500000e-01 : f32
    %65 = vector.broadcast %cst_43 : f32 to vector<144x2xf32>
    %66 = arith.mulf %64, %65 : vector<144x2xf32>
    %c0_44 = arith.constant 0 : index
    %c0_45 = arith.constant 0 : index
    %67 = vector.load %arg8[%c0_44, %c0_45] : memref<1x2xf32, #tpu.memory_space<vmem>>, vector<1x2xf32>
    %68 = vector.broadcast %67 : vector<1x2xf32> to vector<144x2xf32>
    %69 = arith.addf %66, %68 : vector<144x2xf32>
    %cst_46 = arith.constant 0.000000e+00 : f32
    %70 = vector.broadcast %cst_46 : f32 to vector<144x2xf32>
    %71 = arith.subf %70, %69 : vector<144x2xf32>
    %72 = math.exp %71 : vector<144x2xf32>
    %cst_47 = arith.constant 1.000000e+00 : f32
    %73 = vector.broadcast %cst_47 : f32 to vector<144x2xf32>
    %74 = arith.addf %73, %72 : vector<144x2xf32>
    %75 = tpu.reciprocal %74 {approx = true} : vector<144x2xf32> -> vector<144x2xf32>
    %c0_48 = arith.constant 0 : index
    %c0_49 = arith.constant 0 : index
    %76 = vector.load %arg9[%c0_48, %c0_49] : memref<1x2xf32, #tpu.memory_space<vmem>>, vector<1x2xf32>
    %77 = vector.broadcast %76 : vector<1x2xf32> to vector<144x2xf32>
    %78 = arith.mulf %75, %77 : vector<144x2xf32>
    %c0_50 = arith.constant 0 : index
    %c0_51 = arith.constant 0 : index
    %79 = vector.load %arg10[%c0_50, %c0_51] : memref<2x32xf32, #tpu.memory_space<vmem>>, vector<2x32xf32>
    %cst_52 = arith.constant dense<0.000000e+00> : vector<144x32xf32>
    %80 = tpu.matmul %78, %79, %cst_52 {dimension_numbers = #tpu.dot_dimension_numbers<[1], [0], [0], [1], [0, 0, 1, 1], [], []>, precision = #tpu.contract_precision<fp32>} : vector<144x2xf32>, vector<2x32xf32>, vector<144x32xf32> -> vector<144x32xf32>
    %81 = arith.mulf %53, %80 : vector<144x32xf32>
    %c0_53 = arith.constant 0 : index
    %c0_54 = arith.constant 0 : index
    %c0_55 = arith.constant 0 : index
    %c0_56 = arith.constant 0 : index
    %82 = vector.load %arg11[%c0_53, %c0_54, %c0_55, %c0_56] : memref<1x1x144x32xf32, #tpu.memory_space<vmem>>, vector<1x1x144x32xf32>
    %83 = vector.shape_cast %82 : vector<1x1x144x32xf32> to vector<144x32xf32>
    %84 = vector.shape_cast %81 : vector<144x32xf32> to vector<1x1x144x32xf32>
    tpu.vector_store %arg11[%c0_53, %c0_54, %c0_55, %c0_56], %84 {strides = array<i32>} : memref<1x1x144x32xf32, #tpu.memory_space<vmem>>, vector<1x1x144x32xf32>,
    return
  }
  func.func @transform_0(%arg0: i32, %arg1: i32) -> (i32, i32, i32, i32) {
    %c0_i32 = arith.constant 0 : i32
    %c0_i32_0 = arith.constant 0 : i32
    %c0_i32_1 = arith.constant 0 : i32
    return %arg0, %arg1, %c0_i32, %c0_i32_0 : i32, i32, i32, i32
  }
  func.func @transform_1(%arg0: i32, %arg1: i32) -> (i32, i32, i32) {
    %c0_i32 = arith.constant 0 : i32
    %c0_i32_0 = arith.constant 0 : i32
    %c0_i32_1 = arith.constant 0 : i32
    return %arg0, %c0_i32, %c0_i32_0 : i32, i32, i32
  }
  func.func @transform_2(%arg0: i32, %arg1: i32) -> (i32, i32) {
    %c0_i32 = arith.constant 0 : i32
    %c0_i32_0 = arith.constant 0 : i32
    %c0_i32_1 = arith.constant 0 : i32
    return %c0_i32, %c0_i32_0 : i32, i32
  }
  func.func @transform_3(%arg0: i32, %arg1: i32) -> (i32, i32) {
    %c0_i32 = arith.constant 0 : i32
    %c0_i32_0 = arith.constant 0 : i32
    %c0_i32_1 = arith.constant 0 : i32
    return %c0_i32, %c0_i32_0 : i32, i32
  }
  func.func @transform_4(%arg0: i32, %arg1: i32) -> (i32, i32, i32) {
    %c0_i32 = arith.constant 0 : i32
    %c0_i32_0 = arith.constant 0 : i32
    %c0_i32_1 = arith.constant 0 : i32
    %c0_i32_2 = arith.constant 0 : i32
    return %c0_i32, %c0_i32_0, %c0_i32_1 : i32, i32, i32
  }
  func.func @transform_5(%arg0: i32, %arg1: i32) -> (i32, i32) {
    %c0_i32 = arith.constant 0 : i32
    %c0_i32_0 = arith.constant 0 : i32
    %c0_i32_1 = arith.constant 0 : i32
    return %c0_i32, %c0_i32_0 : i32, i32
  }
  func.func @transform_6(%arg0: i32, %arg1: i32) -> (i32, i32) {
    %c0_i32 = arith.constant 0 : i32
    %c0_i32_0 = arith.constant 0 : i32
    %c0_i32_1 = arith.constant 0 : i32
    return %c0_i32, %c0_i32_0 : i32, i32
  }
  func.func @transform_7(%arg0: i32, %arg1: i32) -> (i32, i32) {
    %c0_i32 = arith.constant 0 : i32
    %c0_i32_0 = arith.constant 0 : i32
    %c0_i32_1 = arith.constant 0 : i32
    return %c0_i32, %c0_i32_0 : i32, i32
  }
  func.func @transform_8(%arg0: i32, %arg1: i32) -> (i32, i32) {
    %c0_i32 = arith.constant 0 : i32
    %c0_i32_0 = arith.constant 0 : i32
    %c0_i32_1 = arith.constant 0 : i32
    return %c0_i32, %c0_i32_0 : i32, i32
  }
  func.func @transform_9(%arg0: i32, %arg1: i32) -> (i32, i32, i32, i32) {
    %c0_i32 = arith.constant 0 : i32
    %c0_i32_0 = arith.constant 0 : i32
    %c0_i32_1 = arith.constant 0 : i32
    return %arg0, %arg1, %c0_i32, %c0_i32_0 : i32, i32, i32, i32
  }
}

</mosaic_0001>

<bundles_post_ra>
// kernel: tpu_custom_call.1
= control target key start
LH: loop header
LB: loop body
LE: loop exit
PB: predicated region body
PF: predicated region fallthrough
CT: control target
= control target key end

     0   :  { %s5558_s30 = smov 0   ;;  %s5560_s10 = smov 0   ;;  %s6912_s0 = inlined_call_operand.vmem [shape: bf16[2,2,198,4], index: 0, kind: input, shape index: {}]   ;;  %s6913_s1 = inlined_call_operand.vmem [shape: bf16[2,32,16], index: 1, kind: input, shape index: {}]   ;;  %s6914_s2 = inlined_call_operand.vmem [shape: bf16[4,32], index: 2, kind: input, shape index: {}]   ;;  %s6915_s3 = inlined_call_operand.vmem [shape: f32[1,32], index: 3, kind: input, shape index: {}]   ;;  %s6916_s4 = inlined_call_operand.vmem [shape: bf16[9,4,32], index: 4, kind: input, shape index: {}]   ;;  %s6917_s5 = inlined_call_operand.vmem [shape: f32[1,32], index: 5, kind: input, shape index: {}]   ;;  %s6918_s6 = inlined_call_operand.vmem [shape: f32[1,2], index: 6, kind: input, shape index: {}]   ;;  %s6919_s7 = inlined_call_operand.vmem [shape: f32[1,2], index: 7, kind: input, shape index: {}]   ;;  %s6920_s8 = inlined_call_operand.vmem [shape: f32[2,32], index: 8, kind: input, shape index: {}]   ;;  %s6921_s9 = inlined_call_operand.vmem [shape: f32[2,2,144,32], index: 9, kind: output, shape index: {}]  }
   0x1   :  { %s5562_s11 = smov 0   ;;  %s5564_s12 = smov 0  }
   0x2   :  { %s5566_s13 = smov 0  }
   0x3 LB: > { %s28_s14 = sadd.s32 1, %s5496_s11  ;;  %s31_s15 = sadd.s32 1, %s5500_s12  ;;  %s5504_s13 = sphi %s5566_s13, %s19_s13   ;;  %s5500_s12 = sphi %s5564_s12, %s6971_s12   ;;  %s5496_s11 = sphi %s5562_s11, %s6970_s11   ;;  %s5492_s10 = sphi %s5560_s10, %s6969_s10   ;;  %s5488_s30 = sphi %s5558_s30, %s6968_s30  }
   0x4   : > { %p29_p0 = scmp.ge.s32.totalorder %s28_s14, 2  ;;  %p3996_p1 = scmp.ge.s32.totalorder %s5504_s13, 1 }
   0x5   : > { %p317_p2 = scmp.lt.s32.totalorder %s5504_s13, 5 }
   0x6   : > { %s6973_s14 = smov (%p29_p0, %s28_s14), 0  ;;  %s6975_s15 = smov (!%p29_p0, %s31_s15), %s5500_s12 }
   0x7   : > { %p318_p3 = pnand %p3996_p1, %p317_p2  ;;  %p33_p4 = scmp.ge.s32.totalorder %s6975_s15, 2 }
   0x9   : > { %s6977_s15 = smov (%p33_p4, %s6975_s15), 0  ;;  %321 = sbr.rel (%p318_p3) target bundleno = 1119 (0x45f), region = 56 }
  0x10   : > { %v413_v0 = vld [vmem:[%s6914_s2] sm:$0x3]  ;;  %vm587_vm0 = vcmask 1041408   ;;  %v4042_v1 = vld [vmem:[%s6916_s4 + $0x2] sm:$0x3]  ;;  %v5506_v2 = vmov 0.0  }
  0x11   : > { %4356 = vmatprep.subr.bf16.mxu0 %v5506_v2  ;;  %4470 = vmatprep.subr.bf16.mxu1 %v5506_v2  ;;  %v589_v3 = vsel %vm587_vm0, %v413_v0, 0  ;;  %v1031_v4 = vsel %vm587_vm0, %v4042_v1, 0  ;;  %p366_p5 = scmp.lt.s32.totalorder %s5492_s10, 1  ;;  %p368_p6 = scmp.lt.s32.totalorder %s5488_s30, 1  ;;  %vm5507_vm1 = vmmov 0   ;;  %vm559_vm4 = vcmask 31744  }
  0x12   : > { %4357 = vmatpush3.bf16.msra.mxu0 %v589_v3  ;;  %4471 = vmatpush3.bf16.msra.mxu1 %v1031_v4  ;;  %vm469_vm2 = vsmask.f32 6400  ;;  %vm967_vm3 = vsmask.f32 7424  ;;  %v4021_v12 = vld [vmem:[%s6916_s4 + $0x8] sm:$0x3] }
  0x13   : > { %4358 = vmatprep.mubr.msk.bf16.mxu0 %vm5507_vm1, %v5506_v2  ;;  %4472 = vmatprep.mubr.msk.bf16.mxu1 %vm5507_vm1, %v5506_v2  ;;  %s6979_s10 = smov (!%p366_p5, %s5492_s10), 1  ;;  %s6981_s30 = smov (!%p368_p6, %s5488_s30), 1  ;;  %v4053_v20 = vld [vmem:[%s6916_s4 + $0x4] sm:$0x3]  ;;  %v706_v29 = vsel %vm587_vm0, %v4021_v12, 0  ;;  %vm1158_vm5 = vcmask 1046528  }
  0x14   : > { %4394 = vmatprep.subr.bf16.mxu0 %v5506_v2  ;;  %4508 = vmatprep.subr.bf16.mxu1 %v5506_v2  ;;  %s5329_s20 = smul.u32 50, %s6979_s10  ;;  %v1206_v34 = vsel %vm587_vm0, %v4053_v20, 0  ;;  %s4130_s17 = sshll.u32 %s6979_s10, 4  ;;  %vm1471_vm6 = vcmask 1045504   ;;  %vm2193_vm7 = vcmask 261120   ;;  %vm2326_vm9 = vcmask 64512  }
  0x15   : > { %s5328_s21 = smul.u32 25, %s6981_s30  ;;  %vm1790_vm8 = vsmask.f32 5376  ;;  %vm1995_vm10 = vcmask 1044480   ;;  %vm2381_vm11 = vcmask 130112   ;;  %vm2436_vm12 = vcmask 7168  }
  0x16   : > { %vm2614_vm13 = vcmask 15360   ;;  %s5330_s16 = smul.u32 18, %s6981_s30 }
  0x17   : > { %s372_s22 = sadd.s32 %s5329_s20, %s5328_s21  ;;  %s5744_s20 = scalar_lea.vmem %s6913_s1, %s4130_s17 }
  0x18   : > { %s3997_s23 = sshll.u32 %s372_s22, 2  ;;  %s5331_s17 = smul.u32 36, %s6979_s10 }
  0x19   : > { %s5621_s26 = scalar_lea.vmem %s6912_s0, %s3997_s23 }
  0x1a   : > { %v5624_v5 = vld [vmem:[%s5621_s26 + $0x8] sm:$0xff]   ;;  %v5627_v6 = vld [vmem:[%s5621_s26 + $0x10] sm:$0xff]   ;;  %v5630_v7 = vld [vmem:[%s5621_s26] sm:$0xff]   ;;  %s386_s18 = sadd.s32 %s5331_s17, %s5330_s16 }
  0x1b   : > { %v471_v8 = vshrl.u32 %v5624_v5, 16  ;;  %v474_v9 = vshll.u32 %v5624_v5, 16  ;;  %v5635_v10 = vshrl.u32 %v5627_v6, 16  ;;  %v5638_v11 = vshll.u32 %v5627_v6, 16  ;;  %v5646_v15 = vld [vmem:[%s5621_s26 + $0x18] sm:$0xff]   ;;  %v5660_v27 = vld [vmem:[%s5621_s26 + $0x20] sm:$0xff]  }
  0x1c   : > { %v968_v13 = vshrl.u32 %v5630_v7, 16  ;;  %v970_v14 = vshll.u32 %v5630_v7, 16  ;;  %v5654_v23 = vshrl.u32 %v5646_v15, 16  ;;  %v5657_v24 = vshll.u32 %v5646_v15, 16  ;;  %v5692_v43 = vld [vmem:[%s5621_s26 + $0x28] sm:$0xff]   ;;  %v5716_v53 = vld [vmem:[%s5621_s26 + $0x30] sm:$0xff]  }
  0x1d   : > { %v473_v16 = vrot.slane %v471_v8, 1  ;;  %v476_v17 = vrot.slane %v474_v9, 2  ;;  %v481_v18 = vrot.slane %v5635_v10, 1  ;;  %v484_v19 = vrot.slane %v5638_v11, 2  ;;  %v408_v58 = vld [vmem:[%s5621_s26 + $0x48] sm:$0xf] }
  0x1e   : > { %v972_v21 = vrot.slane %v970_v14, 1  ;;  %v974_v22 = vrot.slane %v474_v9, 1  ;;  %v490_v30 = vrot.slane %v5654_v23, 1  ;;  %v493_v31 = vrot.slane %v5657_v24, 2  ;;  %v5737_v61 = vld [vmem:[%s5621_s26 + $0x40] sm:$0xff]   ;;  %s4000_s19 = sshll.u32 %s386_s18, 3 }
  0x1f   : > { %v477_v25 = vor.u32 %v476_v17, %v473_v16  ;;  %v485_v26 = vor.u32 %v484_v19, %v481_v18  ;;  %v5674_v36 = vshrl.u32 %v5660_v27, 16  ;;  %v5677_v37 = vshll.u32 %v5660_v27, 16 }
  0x20   : > { %v973_v28 = vor.u32 %v972_v21, %v968_v13  ;;  %v494_v35 = vor.u32 %v493_v31, %v490_v30  ;;  %v976_v38 = vor.u32 %v974_v22, %v471_v8  ;;  %v977_v39 = vrot.slane %v5638_v11, 1  ;;  %v5756_v8 = vld [vmem:[%s5621_s26 + $0x38] sm:$0xff]   ;;  %v409_v31 = vld [vmem:[%s5621_s26 + $0x4c] sm:$0xf] }
  0x21   : > { %v5666_v32 = vsel %vm469_vm2, %v477_v25, %v485_v26  ;;  %v499_v41 = vrot.slane %v5674_v36, 1  ;;  %v502_v42 = vrot.slane %v5677_v37, 2  ;;  %v5701_v46 = vshrl.u32 %v5692_v43, 16 }
  0x22   : > { %4359 = vmatmul.mubr.msk.bf16.vlgmr.msra.gmra.mrb[0].mxu0 %vm559_vm4, %v5666_v32  ;;  %v975_v33 = vsel %vm967_vm3, %v973_v28, %v974_v22  ;;  %v5687_v40 = vsel %vm469_vm2, %v485_v26, %v494_v35  ;;  %v978_v44 = vsel %vm967_vm3, %v976_v38, %v977_v39  ;;  %v5704_v47 = vshll.u32 %v5692_v43, 16 }
  0x23   : > { %4473 = vmatmul.mubr.msk.bf16.vlgmr.msra.gmra.mrb[0].mxu1 %vm559_vm4, %v975_v33  ;;  %4395 = vmatpush3.bf16.msra.mxu0 %v706_v29  ;;  %v503_v45 = vor.u32 %v502_v42, %v499_v41  ;;  %v979_v48 = vor.u32 %v977_v39, %v5635_v10  ;;  %v980_v49 = vrot.slane %v5657_v24, 1  ;;  %v508_v51 = vrot.slane %v5701_v46, 1 }
  0x24   : > { %4362 = vmatprep.mubr.msk.bf16.mxu0 %vm5507_vm1, %v5506_v2  ;;  %4476 = vmatprep.mubr.msk.bf16.mxu1 %vm5507_vm1, %v5506_v2  ;;  %v511_v52 = vrot.slane %v5704_v47, 2  ;;  %v5725_v56 = vshrl.u32 %v5716_v53, 16  ;;  %v5728_v57 = vshll.u32 %v5716_v53, 16  ;;  %v983_v60 = vrot.slane %v5677_v37, 1 }
  0x25   : > { %4509 = vmatpush3.bf16.msra.mxu1 %v1206_v34  ;;  %4432 = vmatprep.subr.bf16.mxu0 %v5506_v2  ;;  %v5711_v50 = vsel %vm469_vm2, %v494_v35, %v503_v45  ;;  %v981_v54 = vsel %vm967_vm3, %v979_v48, %v980_v49  ;;  %v982_v59 = vor.u32 %v980_v49, %v5654_v23  ;;  %v5747_v63 = vrot.slane %v5737_v61, 1  ;;  %v5820_v49 = vld [vmem:[%s5621_s26 + $0x50] sm:$0xf] }
  0x26   : > { %4546 = vmatprep.subr.bf16.mxu1 %v5506_v2  ;;  %v512_v55 = vor.u32 %v511_v52, %v508_v51  ;;  %v5739_v62 = vcombine.low %v408_v58, %v408_v58  ;;  %v517_v3 = vrot.slane %v5725_v56, 1  ;;  %v520_v4 = vrot.slane %v5728_v57, 2 }
  0x27   : > { %v984_v9 = vsel %vm967_vm3, %v982_v59, %v983_v60  ;;  %v5769_v14 = vshrl.u32 %v5756_v8, 16  ;;  %v5772_v16 = vshll.u32 %v5756_v8, 16  ;;  %v985_v17 = vor.u32 %v983_v60, %v5674_v36 }
  0x28   : > { %v1176_v0 = vrot.slane %v5739_v62, 1  ;;  %v5751_v1 = vsel %vm469_vm2, %v503_v45, %v512_v55  ;;  %v521_v13 = vor.u32 %v520_v4, %v517_v3  ;;  %v986_v18 = vrot.slane %v5704_v47, 1 }
  0x29   : > { %v526_v20 = vrot.slane %v5769_v14, 1  ;;  %v529_v21 = vrot.slane %v5772_v16, 2  ;;  %v5790_v26 = vshrl.u32 %v5737_v61, 16  ;;  %v5793_v28 = vshll.u32 %v5737_v61, 16 }
  0x2a   : > { %4363 = vmatmul.mubr.msk.bf16.gmra.mrb[4].mxu0 %vm559_vm4, %v5687_v40  ;;  %v5761_v12 = vsel %vm1158_vm5, %v5747_v63, %v1176_v0  ;;  %v5779_v19 = vsel %vm469_vm2, %v512_v55, %v521_v13  ;;  %v987_v22 = vsel %vm967_vm3, %v985_v17, %v986_v18  ;;  %v988_v29 = vor.u32 %v986_v18, %v5701_v46 }
  0x2b   : > { %4477 = vmatmul.mubr.msk.bf16.gmra.mrb[4].mxu1 %vm559_vm4, %v978_v44  ;;  %4366 = vmatprep.mubr.msk.bf16.mxu0 %vm5507_vm1, %v5506_v2  ;;  %v530_v25 = vor.u32 %v529_v21, %v526_v20  ;;  %v989_v30 = vrot.slane %v5728_v57, 1  ;;  %v535_v34 = vrot.slane %v5790_v26, 1  ;;  %v538_v35 = vrot.slane %v5793_v28, 2 }
  0x2c   : > { %4480 = vmatprep.mubr.msk.bf16.mxu1 %vm5507_vm1, %v5506_v2  ;;  %v5805_v38 = vcombine.low %v408_v58, %v409_v31  ;;  %v992_v48 = vrot.slane %v5772_v16, 1  ;;  %v5831_v55 = vcombine.low %v5820_v49, %v5820_v49  ;;  %v995_v4 = vrot.slane %v5793_v28, 1 }
  0x2d   : > { %v5801_v33 = vsel %vm469_vm2, %v521_v13, %v530_v25  ;;  %v990_v39 = vsel %vm967_vm3, %v988_v29, %v989_v30  ;;  %v539_v41 = vor.u32 %v538_v35, %v535_v34  ;;  %v991_v45 = vor.u32 %v989_v30, %v5725_v56  ;;  %v813_v34 = vld [vmem:[%s6916_s4] sm:$0x3]  ;;  %v4063_v35 = vld [vmem:[%s6916_s4 + $0x6] sm:$0x3] }
  0x2e   : > { %v542_v42 = vshrl.u32 %v5805_v38, 16  ;;  %v545_v44 = vshll.u32 %v5805_v38, 16  ;;  %v551_v60 = vshrl.u32 %v5831_v55, 16  ;;  %v554_v0 = vshll.u32 %v5831_v55, 16 }
  0x2f   : > { %v5823_v51 = vsel %vm469_vm2, %v530_v25, %v539_v41  ;;  %v993_v58 = vsel %vm967_vm3, %v991_v45, %v992_v48  ;;  %v994_v3 = vor.u32 %v992_v48, %v5769_v14  ;;  %v999_v20 = vshll.u32 %v5739_v62, 16 }
  0x30   : > { %v544_v52 = vrot.slane %v542_v42, 1  ;;  %v553_v13 = vrot.slane %v551_v60, 1  ;;  %v556_v17 = vrot.slane %v554_v0, 2  ;;  %v1159_v30 = vrot.slane %v5630_v7, 1 }
  0x31   : > { %v996_v18 = vsel %vm967_vm3, %v994_v3, %v995_v4  ;;  %v1001_v25 = vrot.slane %v999_v20, 1  ;;  %v1160_v31 = vrot.slane %v5624_v5, 1  ;;  %v1333_v45 = vrot.slane %v5805_v38, 1  ;;  %v6048_v20 = vld [vmem:[%s6915_s3] ss:$0 sm:$0xff] }
  0x32   : > { %4367 = vmatmul.mubr.msk.bf16.gmra.mrb[8].mxu0 %vm559_vm4, %v5711_v50  ;;  %v557_v21 = vor.u32 %v556_v17, %v553_v13  ;;  %v1344_v48 = vsel %vm587_vm0, %v4063_v35, 0  ;;  %v1472_v17 = vrot.slane %v5624_v5, 2  ;;  %v1475_v35 = vrot.slane %v5646_v15, 2 }
  0x33   : > { %4481 = vmatmul.mubr.msk.bf16.gmra.mrb[8].mxu1 %vm559_vm4, %v981_v54  ;;  %4370 = vmatprep.mubr.msk.bf16.mxu0 %vm5507_vm1, %v5506_v2  ;;  %v547_v54 = vrot.slane %v545_v44, 2 }
  0x34   : > { %4484 = vmatprep.mubr.msk.bf16.mxu1 %vm5507_vm1, %v5506_v2 }
  0x35   : > { %v548_v59 = vor.u32 %v547_v54, %v544_v52  ;;  %v5887_v52 = vsel %vm1158_vm5, %v5747_v63, %v1333_v45  ;;  %v1162_v54 = vrot.slane %v5627_v6, 1 }
  0x37   : > { %v5859_v29 = vsel %vm469_vm2, %v548_v59, %v557_v21 }
  0x3a   : > { %4371 = vmatmul.mubr.msk.bf16.gmra.mrb[12].mxu0 %vm559_vm4, %v5751_v1 }
  0x3b   : > { %4485 = vmatmul.mubr.msk.bf16.gmra.mrb[12].mxu1 %vm559_vm4, %v984_v9  ;;  %4374 = vmatprep.mubr.msk.bf16.mxu0 %vm5507_vm1, %v5506_v2  ;;  %v5846_v9 = vsel %vm469_vm2, %v539_v41, %v548_v59  ;;  %v839_v41 = vsel %vm587_vm0, %v813_v34, 0 }
  0x3c   : > { %4488 = vmatprep.mubr.msk.bf16.mxu1 %vm5507_vm1, %v5506_v2 }
  0x42   : > { %4375 = vmatmul.mubr.msk.bf16.gmra.mrb[16].mxu0 %vm559_vm4, %v5779_v19 }
  0x43   : > { %4489 = vmatmul.mubr.msk.bf16.gmra.mrb[16].mxu1 %vm559_vm4, %v987_v22  ;;  %4378 = vmatprep.mubr.msk.bf16.mxu0 %vm5507_vm1, %v5506_v2  ;;  %v997_v22 = vor.u32 %v995_v4, %v5790_v26 }
  0x44   : > { %4492 = vmatprep.mubr.msk.bf16.mxu1 %vm5507_vm1, %v5506_v2 }
  0x45   : > { %v1002_v62 = vsel %vm967_vm3, %v997_v22, %v1001_v25 }
  0x4a   : > { %4379 = vmatmul.mubr.msk.bf16.gmra.mrb[20].mxu0 %vm559_vm4, %v5801_v33 }
  0x4b   : > { %4493 = vmatmul.mubr.msk.bf16.gmra.mrb[20].mxu1 %vm559_vm4, %v990_v39  ;;  %4382 = vmatprep.mubr.msk.bf16.mxu0 %vm5507_vm1, %v5506_v2  ;;  %v1161_v39 = vsel %vm1158_vm5, %v1159_v30, %v1160_v31 }
  0x4c   : > { %4496 = vmatprep.mubr.msk.bf16.mxu1 %vm5507_vm1, %v5506_v2 }
  0x52   : > { %4383 = vmatmul.mubr.msk.bf16.gmra.mrb[24].mxu0 %vm559_vm4, %v5823_v51 }
  0x53   : > { %4497 = vmatmul.mubr.msk.bf16.gmra.mrb[24].mxu1 %vm559_vm4, %v993_v58  ;;  %4386 = vmatprep.mubr.msk.bf16.mxu0 %vm5507_vm1, %v5506_v2  ;;  %v1164_v58 = vrot.slane %v5646_v15, 1 }
  0x54   : > { %4500 = vmatprep.mubr.msk.bf16.mxu1 %vm5507_vm1, %v5506_v2 }
  0x55   : > { %v1165_v59 = vsel %vm1158_vm5, %v1162_v54, %v1164_v58 }
  0x5a   : > { %4387 = vmatmul.mubr.msk.bf16.gmra.mrb[28].mxu0 %vm559_vm4, %v5846_v9 }
  0x5b   : > { %4501 = vmatmul.mubr.msk.bf16.gmra.mrb[28].mxu1 %vm559_vm4, %v996_v18  ;;  %4390 = vmatprep.mubr.msk.bf16.mxu0 %vm5507_vm1, %v5506_v2  ;;  %v1473_v18 = vrot.slane %v5627_v6, 2 }
  0x5c   : > { %4504 = vmatprep.mubr.msk.bf16.mxu1 %vm5507_vm1, %v5506_v2 }
  0x62   : > { %4391 = vmatmul.mubr.msk.bf16.gmra.mrb[32].mxu0 %vm559_vm4, %v5859_v29 }
  0x63   : > { %4505 = vmatmul.mubr.msk.bf16.gmra.mrb[32].mxu1 %vm559_vm4, %v1002_v62  ;;  %4396 = vmatprep.mubr.msk.bf16.mxu0 %vm5507_vm1, %v5506_v2 }
  0x64   : > { %4510 = vmatprep.mubr.msk.bf16.mxu1 %vm5507_vm1, %v5506_v2 }
  0x6a   : > { %4397 = vmatmul.mubr.msk.bf16.vlgmr.msra.gmra.mrb[36].mxu0 %vm559_vm4, %v5666_v32  ;;  %v1163_v32 = vsel %vm1158_vm5, %v1160_v31, %v1162_v54 }
  0x6b   : > { %4511 = vmatmul.mubr.msk.bf16.vlgmr.msra.gmra.mrb[0].mxu1 %vm559_vm4, %v1161_v39  ;;  %4433 = vmatpush3.bf16.msra.mxu0 %v839_v41 }
  0x6c   : > { %4400 = vmatprep.mubr.msk.bf16.mxu0 %vm5507_vm1, %v5506_v2  ;;  %4514 = vmatprep.mubr.msk.bf16.mxu1 %vm5507_vm1, %v5506_v2 }
  0x6d   : > { %4547 = vmatpush3.bf16.msra.mxu1 %v1344_v48  ;;  %4736 = vmatprep.subr.bf16.mxu0 %v5506_v2 }
  0x6e   : > { %4584 = vmatprep.subr.bf16.mxu1 %v5506_v2 }
  0x72   : > { %4401 = vmatmul.mubr.msk.bf16.gmra.mrb[40].mxu0 %vm559_vm4, %v5687_v40  ;;  %v1166_v40 = vrot.slane %v5660_v27, 1 }
  0x73   : > { %4515 = vmatmul.mubr.msk.bf16.gmra.mrb[4].mxu1 %vm559_vm4, %v1163_v32  ;;  %4404 = vmatprep.mubr.msk.bf16.mxu0 %vm5507_vm1, %v5506_v2 }
  0x74   : > { %4518 = vmatprep.mubr.msk.bf16.mxu1 %vm5507_vm1, %v5506_v2  ;;  %v1167_v60 = vsel %vm1158_vm5, %v1164_v58, %v1166_v40 }
  0x7a   : > { %4405 = vmatmul.mubr.msk.bf16.gmra.mrb[44].mxu0 %vm559_vm4, %v5711_v50  ;;  %v1168_v50 = vrot.slane %v5692_v43, 1 }
  0x7b   : > { %4519 = vmatmul.mubr.msk.bf16.gmra.mrb[8].mxu1 %vm559_vm4, %v1165_v59  ;;  %4408 = vmatprep.mubr.msk.bf16.mxu0 %vm5507_vm1, %v5506_v2 }
  0x7c   : > { %4522 = vmatprep.mubr.msk.bf16.mxu1 %vm5507_vm1, %v5506_v2  ;;  %v1169_v0 = vsel %vm1158_vm5, %v1166_v40, %v1168_v50 }
  0x82   : > { %4409 = vmatmul.mubr.msk.bf16.gmra.mrb[48].mxu0 %vm559_vm4, %v5751_v1  ;;  %v1170_v1 = vrot.slane %v5716_v53, 1 }
  0x83   : > { %4523 = vmatmul.mubr.msk.bf16.gmra.mrb[12].mxu1 %vm559_vm4, %v1167_v60  ;;  %4412 = vmatprep.mubr.msk.bf16.mxu0 %vm5507_vm1, %v5506_v2 }
  0x84   : > { %4526 = vmatprep.mubr.msk.bf16.mxu1 %vm5507_vm1, %v5506_v2  ;;  %v1171_v3 = vsel %vm1158_vm5, %v1168_v50, %v1170_v1 }
  0x8a   : > { %4413 = vmatmul.mubr.msk.bf16.gmra.mrb[52].mxu0 %vm559_vm4, %v5779_v19  ;;  %v1172_v19 = vrot.slane %v5756_v8, 1 }
  0x8b   : > { %4527 = vmatmul.mubr.msk.bf16.gmra.mrb[16].mxu1 %vm559_vm4, %v1169_v0  ;;  %4416 = vmatprep.mubr.msk.bf16.mxu0 %vm5507_vm1, %v5506_v2 }
  0x8c   : > { %4530 = vmatprep.mubr.msk.bf16.mxu1 %vm5507_vm1, %v5506_v2  ;;  %v1173_v4 = vsel %vm1158_vm5, %v1170_v1, %v1172_v19 }
  0x92   : > { %4417 = vmatmul.mubr.msk.bf16.gmra.mrb[56].mxu0 %vm559_vm4, %v5801_v33  ;;  %v1175_v33 = vsel %vm1158_vm5, %v1172_v19, %v5747_v63  ;;  %v5386_v63 = vld [vmem:[%s5744_s20] sm:$0xff]  }
  0x93   : > { %4531 = vmatmul.mubr.msk.bf16.gmra.mrb[20].mxu1 %vm559_vm4, %v1171_v3  ;;  %4420 = vmatprep.mubr.msk.bf16.mxu0 %vm5507_vm1, %v5506_v2 }
  0x94   : > { %4534 = vmatprep.mubr.msk.bf16.mxu1 %vm5507_vm1, %v5506_v2 }
  0x9a   : > { %4421 = vmatmul.mubr.msk.bf16.gmra.mrb[60].mxu0 %vm559_vm4, %v5823_v51  ;;  %v4073_v51 = vld [vmem:[%s6916_s4 + $0xa] sm:$0x3] }
  0x9b   : > { %4535 = vmatmul.mubr.msk.bf16.gmra.mrb[24].mxu1 %vm559_vm4, %v1173_v4  ;;  %4424 = vmatprep.mubr.msk.bf16.mxu0 %vm5507_vm1, %v5506_v2 }
  0x9c   : > { %4538 = vmatprep.mubr.msk.bf16.mxu1 %vm5507_vm1, %v5506_v2 }
  0xa2   : > { %4425 = vmatmul.mubr.msk.bf16.gmra.mrb[64].mxu0 %vm559_vm4, %v5846_v9  ;;  %v1519_v9 = vsel %vm587_vm0, %v4073_v51, 0 }
  0xa3   : > { %4539 = vmatmul.mubr.msk.bf16.gmra.mrb[28].mxu1 %vm559_vm4, %v1175_v33  ;;  %4428 = vmatprep.mubr.msk.bf16.mxu0 %vm5507_vm1, %v5506_v2 }
  0xa4   : > { %4542 = vmatprep.mubr.msk.bf16.mxu1 %vm5507_vm1, %v5506_v2 }
  0xaa   : > { %4429 = vmatmul.mubr.msk.bf16.gmra.mrb[68].mxu0 %vm559_vm4, %v5859_v29  ;;  %v4083_v29 = vld [vmem:[%s6916_s4 + $0xc] sm:$0x3] }
  0xab   : > { %4543 = vmatmul.mubr.msk.bf16.gmra.mrb[32].mxu1 %vm559_vm4, %v5761_v12  ;;  %4434 = vmatprep.mubr.msk.bf16.mxu0 %vm5507_vm1, %v5506_v2  ;;  %v5387_v12 = vld [vmem:[%s5744_s20 + $0x8] sm:$0xff]   ;;  %v1663_v34 = vsel %vm587_vm0, %v4083_v29, 0 }
  0xac   : > { %4548 = vmatprep.mubr.msk.bf16.mxu1 %vm5507_vm1, %v5506_v2 }
  0xb2   : > { %4435 = vmatmul.mubr.msk.bf16.vlgmr.msra.gmra.mrb[36].mxu0 %vm559_vm4, %v5630_v7  ;;  %v1335_v7 = vrot.slane %v5831_v55, 1 }
  0xb3   : > { %4549 = vmatmul.mubr.msk.bf16.vlgmr.msra.gmra.mrb[0].mxu1 %vm559_vm4, %v1163_v32  ;;  %4737 = vmatpush3.bf16.msra.mxu0 %v5386_v63  ;;  %v6068_v32 = vsel %vm1471_vm6, %v1473_v18, %v1475_v35 }
  0xb4   : > { %4438 = vmatprep.mubr.msk.bf16.mxu0 %vm5507_vm1, %v5506_v2  ;;  %4552 = vmatprep.mubr.msk.bf16.mxu1 %vm5507_vm1, %v5506_v2  ;;  %v1336_v13 = vsel %vm1158_vm5, %v1333_v45, %v1335_v7 }
  0xb5   : > { %4738 = vmatprep.subr.bf16.mxu0 %v5506_v2  ;;  %4585 = vmatpush3.bf16.msra.mxu1 %v1519_v9 }
  0xb6   : > { %4622 = vmatprep.subr.bf16.mxu1 %v5506_v2 }
  0xb7   : > { %4739 = vmatpush3.bf16.msra.mxu0 %v5387_v12 }
  0xba   : > { %4439 = vmatmul.mubr.msk.bf16.gmra.mrb[40].mxu0 %vm559_vm4, %v5624_v5 }
  0xbb   : > { %4553 = vmatmul.mubr.msk.bf16.gmra.mrb[4].mxu1 %vm559_vm4, %v1165_v59  ;;  %4442 = vmatprep.mubr.msk.bf16.mxu0 %vm5507_vm1, %v5506_v2 }
  0xbc   : > { %4556 = vmatprep.mubr.msk.bf16.mxu1 %vm5507_vm1, %v5506_v2 }
  0xc2   : > { %4443 = vmatmul.mubr.msk.bf16.gmra.mrb[44].mxu0 %vm559_vm4, %v5627_v6  ;;  %v1474_v6 = vsel %vm1471_vm6, %v1472_v17, %v1473_v18  ;;  %v1481_v17 = vrot.slane %v5716_v53, 2 }
  0xc3   : > { %4557 = vmatmul.mubr.msk.bf16.gmra.mrb[8].mxu1 %vm559_vm4, %v1167_v60  ;;  %4446 = vmatprep.mubr.msk.bf16.mxu0 %vm5507_vm1, %v5506_v2 }
  0xc4   : > { %4560 = vmatprep.mubr.msk.bf16.mxu1 %vm5507_vm1, %v5506_v2 }
  0xca   : > { %4447 = vmatmul.mubr.msk.bf16.gmra.mrb[48].mxu0 %vm559_vm4, %v5646_v15  ;;  %v1477_v15 = vrot.slane %v5660_v27, 2 }
  0xcb   : > { %4561 = vmatmul.mubr.msk.bf16.gmra.mrb[12].mxu1 %vm559_vm4, %v1169_v0  ;;  %4450 = vmatprep.mubr.msk.bf16.mxu0 %vm5507_vm1, %v5506_v2 }
  0xcc   : > { %4564 = vmatprep.mubr.msk.bf16.mxu1 %vm5507_vm1, %v5506_v2 }
  0xd2   : > { %4451 = vmatmul.mubr.msk.bf16.gmra.mrb[52].mxu0 %vm559_vm4, %v5660_v27  ;;  %v1479_v27 = vrot.slane %v5692_v43, 2 }
  0xd3   : > { %4565 = vmatmul.mubr.msk.bf16.gmra.mrb[16].mxu1 %vm559_vm4, %v1171_v3  ;;  %4454 = vmatprep.mubr.msk.bf16.mxu0 %vm5507_vm1, %v5506_v2  ;;  %v6081_v3 = vsel %vm1471_vm6, %v1475_v35, %v1477_v15 }
  0xd4   : > { %4568 = vmatprep.mubr.msk.bf16.mxu1 %vm5507_vm1, %v5506_v2  ;;  %v6094_v7 = vsel %vm1471_vm6, %v1477_v15, %v1479_v27 }
  0xda   : > { %4455 = vmatmul.mubr.msk.bf16.gmra.mrb[56].mxu0 %vm559_vm4, %v5692_v43 }
  0xdb   : > { %4569 = vmatmul.mubr.msk.bf16.gmra.mrb[20].mxu1 %vm559_vm4, %v1173_v4  ;;  %4458 = vmatprep.mubr.msk.bf16.mxu0 %vm5507_vm1, %v5506_v2 }
  0xdc   : > { %4572 = vmatprep.mubr.msk.bf16.mxu1 %vm5507_vm1, %v5506_v2 }
  0xe2   : > { %4459 = vmatmul.mubr.msk.bf16.gmra.mrb[60].mxu0 %vm559_vm4, %v5716_v53 }
  0xe3   : > { %4573 = vmatmul.mubr.msk.bf16.gmra.mrb[24].mxu1 %vm559_vm4, %v1175_v33  ;;  %4462 = vmatprep.mubr.msk.bf16.mxu0 %vm5507_vm1, %v5506_v2 }
  0xe4   : > { %4576 = vmatprep.mubr.msk.bf16.mxu1 %vm5507_vm1, %v5506_v2 }
  0xea   : > { %4463 = vmatmul.mubr.msk.bf16.gmra.mrb[64].mxu0 %vm559_vm4, %v5756_v8 }
  0xeb   : > { %4577 = vmatmul.mubr.msk.bf16.gmra.mrb[28].mxu1 %vm559_vm4, %v5887_v52  ;;  %4466 = vmatprep.mubr.msk.bf16.mxu0 %vm5507_vm1, %v5506_v2 }
  0xec   : > { %4580 = vmatprep.mubr.msk.bf16.mxu1 %vm5507_vm1, %v5506_v2 }
  0xf2   : > { %4467 = vmatmul.mubr.msk.bf16.gmra.mrb[68].mxu0 %vm559_vm4, %v5737_v61 }
  0xf3   : > { %4581 = vmatmul.mubr.msk.bf16.gmra.mrb[32].mxu1 %vm559_vm4, %v1336_v13  ;;  %4740 = vmatprep.mubr.msk.bf16.mxu0 %vm5507_vm1, %v5506_v2 }
  0xf4   : > { %4586 = vmatprep.mubr.msk.bf16.mxu1 %vm5507_vm1, %v5506_v2 }
  0xf5   : > { %v625_v21 = vpop.f32.mrb[0].mxu0 }
  0xf6   : > { %v4360_v22 = vpop.f32.mrb[1].mxu0  ;;  %v626_v62 = vadd.f32 %v6048_v20, %v625_v21 }
  0xf7   : > { %v628_v25 = vpop.f32.mrb[2].mxu0 }
  0xf8   : > { %v629_v30 = vadd.f32 %v6048_v20, %v628_v25  ;;  %v4361_v5 = vpop.f32.mrb[3].mxu0 }
  0xfa   : > { %v2168_v31 = vpack.c.bf16 %v629_v30, %v626_v62  ;;  %v6107_v30 = vsel %vm1471_vm6, %v1479_v27, %v1481_v17 }
  0xfb   : > { %4587 = vmatmul.mubr.msk.bf16.vlgmr.msra.gmra.mrb[0].mxu1 %vm559_vm4, %v1474_v6  ;;  %v1483_v6 = vrot.slane %v5756_v8, 2 }
  0xfc   : > { %4741 = vmatmul.mubr.msk.bf16.vlgmr.msra.gmra.mrb[72].mxu0 %vm2193_vm7, %v2168_v31  ;;  %4590 = vmatprep.mubr.msk.bf16.mxu1 %vm5507_vm1, %v5506_v2 }
  0xfd   : > { %v633_v39 = vpop.f32.mrb[4].mxu0  ;;  %4744 = vmatprep.mubr.msk.bf16.mxu0 %vm5507_vm1, %v5506_v2  ;;  %4623 = vmatpush3.bf16.msra.mxu1 %v1663_v34 }
  0xfe   : > { %v634_v41 = vadd.f32 %v6048_v20, %v633_v39  ;;  %v4364_v45 = vpop.f32.mrb[5].mxu0  ;;  %4660 = vmatprep.subr.bf16.mxu1 %v5506_v2 }
  0xff   : > { %v636_v48 = vpop.f32.mrb[6].mxu0 }
 0x100   : > { %v637_v52 = vadd.f32 %v6048_v20, %v636_v48  ;;  %v4365_v54 = vpop.f32.mrb[7].mxu0  ;;  %v1484_v48 = vsel %vm1471_vm6, %v1481_v17, %v1483_v6 }
 0x101   : > { %v1485_v54 = vrot.slane %v5737_v61, 2  ;;  %v1487_v61 = vrot.slane %v5805_v38, 2 }
 0x102   : > { %v2169_v58 = vpack.c.bf16 %v637_v52, %v634_v41 }
 0x103   : > { %4591 = vmatmul.mubr.msk.bf16.gmra.mrb[4].mxu1 %vm559_vm4, %v6068_v32 }
 0x104   : > { %4745 = vmatmul.mubr.msk.bf16.gmra.mrb[76].mxu0 %vm2193_vm7, %v2169_v58  ;;  %4594 = vmatprep.mubr.msk.bf16.mxu1 %vm5507_vm1, %v5506_v2 }
 0x105   : > { %v641_v59 = vpop.f32.mrb[8].mxu0  ;;  %4748 = vmatprep.mubr.msk.bf16.mxu0 %vm5507_vm1, %v5506_v2 }
 0x106   : > { %v642_v40 = vadd.f32 %v6048_v20, %v641_v59  ;;  %v4368_v60 = vpop.f32.mrb[9].mxu0 }
 0x107   : > { %v644_v50 = vpop.f32.mrb[10].mxu0 }
 0x108   : > { %v645_v0 = vadd.f32 %v6048_v20, %v644_v50  ;;  %v4369_v1 = vpop.f32.mrb[11].mxu0 }
 0x10a   : > { %v2170_v19 = vpack.c.bf16 %v645_v0, %v642_v40  ;;  %v1486_v0 = vsel %vm1471_vm6, %v1483_v6, %v1485_v54 }
 0x10b   : > { %4595 = vmatmul.mubr.msk.bf16.gmra.mrb[8].mxu1 %vm559_vm4, %v6081_v3 }
 0x10c   : > { %4749 = vmatmul.mubr.msk.bf16.gmra.mrb[80].mxu0 %vm2193_vm7, %v2170_v19  ;;  %4598 = vmatprep.mubr.msk.bf16.mxu1 %vm5507_vm1, %v5506_v2 }
 0x10d   : > { %v649_v4 = vpop.f32.mrb[12].mxu0  ;;  %4752 = vmatprep.mubr.msk.bf16.mxu0 %vm5507_vm1, %v5506_v2 }
 0x10e   : > { %v650_v33 = vadd.f32 %v6048_v20, %v649_v4  ;;  %v4372_v63 = vpop.f32.mrb[13].mxu0 }
 0x10f   : > { %v652_v51 = vpop.f32.mrb[14].mxu0 }
 0x110   : > { %v653_v9 = vadd.f32 %v6048_v20, %v652_v51  ;;  %v4373_v12 = vpop.f32.mrb[15].mxu0 }
 0x112   : > { %v2171_v13 = vpack.c.bf16 %v653_v9, %v650_v33  ;;  %v1488_v9 = vsel %vm1471_vm6, %v1485_v54, %v1487_v61 }
 0x113   : > { %4599 = vmatmul.mubr.msk.bf16.gmra.mrb[12].mxu1 %vm559_vm4, %v6094_v7 }
 0x114   : > { %4753 = vmatmul.mubr.msk.bf16.gmra.mrb[84].mxu0 %vm2193_vm7, %v2171_v13  ;;  %4602 = vmatprep.mubr.msk.bf16.mxu1 %vm5507_vm1, %v5506_v2  ;;  %v1489_v13 = vrot.slane %v5831_v55, 2  ;;  %v4095_v55 = vld [vmem:[%s6916_s4 + $0xe] sm:$0x3] }
 0x115   : > { %v657_v18 = vpop.f32.mrb[16].mxu0  ;;  %4756 = vmatprep.mubr.msk.bf16.mxu0 %vm5507_vm1, %v5506_v2  ;;  %v1868_v6 = vsel %vm587_vm0, %v4095_v55, 0 }
 0x116   : > { %v658_v21 = vadd.f32 %v6048_v20, %v657_v18  ;;  %v4376_v22 = vpop.f32.mrb[17].mxu0 }
 0x117   : > { %v660_v25 = vpop.f32.mrb[18].mxu0 }
 0x118   : > { %v661_v29 = vadd.f32 %v6048_v20, %v660_v25  ;;  %v4377_v62 = vpop.f32.mrb[19].mxu0 }
 0x119   : > { %v1490_v62 = vsel %vm1471_vm6, %v1487_v61, %v1489_v13 }
 0x11a   : > { %v2172_v5 = vpack.c.bf16 %v661_v29, %v658_v21 }
 0x11b   : > { %4603 = vmatmul.mubr.msk.bf16.gmra.mrb[16].mxu1 %vm559_vm4, %v6107_v30 }
 0x11c   : > { %4757 = vmatmul.mubr.msk.bf16.gmra.mrb[88].mxu0 %vm2193_vm7, %v2172_v5  ;;  %4606 = vmatprep.mubr.msk.bf16.mxu1 %vm5507_vm1, %v5506_v2 }
 0x11d   : > { %v665_v31 = vpop.f32.mrb[20].mxu0  ;;  %4760 = vmatprep.mubr.msk.bf16.mxu0 %vm5507_vm1, %v5506_v2 }
 0x11e   : > { %v666_v34 = vadd.f32 %v6048_v20, %v665_v31  ;;  %v4380_v35 = vpop.f32.mrb[21].mxu0 }
 0x11f   : > { %v668_v39 = vpop.f32.mrb[22].mxu0  ;;  %v1792_v35 = vrot.slane %v5638_v11, 3 }
 0x120   : > { %v669_v41 = vadd.f32 %v6048_v20, %v668_v39  ;;  %v4381_v45 = vpop.f32.mrb[23].mxu0  ;;  %v1794_v39 = vrot.slane %v5654_v23, 2 }
 0x122   : > { %v2173_v52 = vpack.c.bf16 %v669_v41, %v666_v34  ;;  %v1791_v34 = vrot.slane %v5635_v10, 2  ;;  %v1795_v41 = vrot.slane %v5657_v24, 3  ;;  %v4105_v10 = vld [vmem:[%s6916_s4 + $0x10] sm:$0x3] }
 0x123   : > { %4607 = vmatmul.mubr.msk.bf16.gmra.mrb[20].mxu1 %vm559_vm4, %v1484_v48 }
 0x124   : > { %4761 = vmatmul.mubr.msk.bf16.gmra.mrb[92].mxu0 %vm2193_vm7, %v2173_v52  ;;  %4610 = vmatprep.mubr.msk.bf16.mxu1 %vm5507_vm1, %v5506_v2  ;;  %v1793_v45 = vor.u32 %v1792_v35, %v1791_v34  ;;  %v1818_v34 = vrot.slane %v542_v42, 2 }
 0x125   : > { %v673_v58 = vpop.f32.mrb[24].mxu0  ;;  %4764 = vmatprep.mubr.msk.bf16.mxu0 %vm5507_vm1, %v5506_v2 }
 0x126   : > { %v674_v15 = vadd.f32 %v6048_v20, %v673_v58  ;;  %v4384_v59 = vpop.f32.mrb[25].mxu0  ;;  %v1798_v58 = vrot.slane %v5674_v36, 2  ;;  %v1802_v36 = vrot.slane %v5701_v46, 2  ;;  %v1807_v46 = vrot.slane %v5728_v57, 3 }
 0x127   : > { %v676_v40 = vpop.f32.mrb[26].mxu0  ;;  %v2043_v59 = vsel %vm587_vm0, %v4105_v10, 0 }
 0x128   : > { %v677_v60 = vadd.f32 %v6048_v20, %v676_v40  ;;  %v4385_v50 = vpop.f32.mrb[27].mxu0 }
 0x12a   : > { %v2174_v1 = vpack.c.bf16 %v677_v60, %v674_v15  ;;  %v1799_v15 = vrot.slane %v5677_v37, 3  ;;  %v1803_v37 = vrot.slane %v5704_v47, 3 }
 0x12b   : > { %4611 = vmatmul.mubr.msk.bf16.gmra.mrb[24].mxu1 %vm559_vm4, %v1486_v0 }
 0x12c   : > { %4765 = vmatmul.mubr.msk.bf16.gmra.mrb[96].mxu0 %vm2193_vm7, %v2174_v1  ;;  %4614 = vmatprep.mubr.msk.bf16.mxu1 %vm5507_vm1, %v5506_v2  ;;  %v1800_v40 = vor.u32 %v1799_v15, %v1798_v58 }
 0x12d   : > { %v681_v19 = vpop.f32.mrb[28].mxu0  ;;  %4768 = vmatprep.mubr.msk.bf16.mxu0 %vm5507_vm1, %v5506_v2 }
 0x12e   : > { %v682_v27 = vadd.f32 %v6048_v20, %v681_v19  ;;  %v4388_v4 = vpop.f32.mrb[29].mxu0  ;;  %v1804_v19 = vor.u32 %v1803_v37, %v1802_v36 }
 0x12f   : > { %v684_v33 = vpop.f32.mrb[30].mxu0 }
 0x130   : > { %v685_v63 = vadd.f32 %v6048_v20, %v684_v33  ;;  %v4389_v51 = vpop.f32.mrb[31].mxu0 }
 0x131   : > { %v1805_v51 = vsel %vm1790_vm8, %v1800_v40, %v1804_v19 }
 0x132   : > { %v2175_v12 = vpack.c.bf16 %v685_v63, %v682_v27 }
 0x133   : > { %4615 = vmatmul.mubr.msk.bf16.gmra.mrb[28].mxu1 %vm559_vm4, %v1488_v9 }
 0x134   : > { %4769 = vmatmul.mubr.msk.bf16.gmra.mrb[100].mxu0 %vm2193_vm7, %v2175_v12  ;;  %4618 = vmatprep.mubr.msk.bf16.mxu1 %vm5507_vm1, %v5506_v2 }
 0x135   : > { %v689_v17 = vpop.f32.mrb[32].mxu0  ;;  %4772 = vmatprep.mubr.msk.bf16.mxu0 %vm5507_vm1, %v5506_v2 }
 0x136   : > { %v690_v18 = vadd.f32 %v6048_v20, %v689_v17  ;;  %v4392_v21 = vpop.f32.mrb[33].mxu0 }
 0x137   : > { %v692_v22 = vpop.f32.mrb[34].mxu0 }
 0x138   : > { %v693_v25 = vadd.f32 %v6048_v20, %v692_v22  ;;  %v4393_v29 = vpop.f32.mrb[35].mxu0  ;;  %v411_v20 = vld [vmem:[%s5621_s26 + $0x54] sm:$0xf]  ;;  %v1810_v22 = vrot.slane %v5769_v14, 2  ;;  %v1815_v14 = vrot.slane %v5793_v28, 3 }
 0x13a   : > { %v2176_v5 = vpack.c.bf16 %v693_v25, %v690_v18 }
 0x13b   : > { %4619 = vmatmul.mubr.msk.bf16.gmra.mrb[32].mxu1 %vm559_vm4, %v1490_v62 }
 0x13c   : > { %4773 = vmatmul.mubr.msk.bf16.gmra.mrb[104].mxu0 %vm2193_vm7, %v2176_v5  ;;  %4624 = vmatprep.mubr.msk.bf16.mxu1 %vm5507_vm1, %v5506_v2 }
 0x143   : > { %4625 = vmatmul.mubr.msk.bf16.vlgmr.msra.gmra.mrb[0].mxu1 %vm559_vm4, %v6068_v32  ;;  %v6183_v32 = vcombine.low %v5820_v49, %v411_v20 }
 0x144   : > { %4628 = vmatprep.mubr.msk.bf16.mxu1 %vm5507_vm1, %v5506_v2  ;;  %4661 = vmatpush3.bf16.msra.mxu1 %v1868_v6  ;;  %v1814_v6 = vrot.slane %v5790_v26, 2  ;;  %v1819_v26 = vrot.slane %v545_v44, 3 }
 0x145   : > { %4698 = vmatprep.subr.bf16.mxu1 %v5506_v2  ;;  %v1823_v35 = vshrl.u32 %v6183_v32, 16 }
 0x146   : > { %v1820_v28 = vor.u32 %v1819_v26, %v1818_v34 }
 0x147   : > { %v1825_v10 = vrot.slane %v1823_v35, 2 }
 0x14b   : > { %4629 = vmatmul.mubr.msk.bf16.gmra.mrb[4].mxu1 %vm559_vm4, %v6081_v3  ;;  %v1652_v3 = vrot.slane %v6183_v32, 2 }
 0x14c   : > { %4632 = vmatprep.mubr.msk.bf16.mxu1 %vm5507_vm1, %v5506_v2 }
 0x153   : > { %4633 = vmatmul.mubr.msk.bf16.gmra.mrb[8].mxu1 %vm559_vm4, %v6094_v7  ;;  %v6190_v7 = vld [vmem:[%s5621_s26 + $0x58] ss:$0 sps:$4 sm:$0xff]  }
 0x154   : > { %4636 = vmatprep.mubr.msk.bf16.mxu1 %vm5507_vm1, %v5506_v2  ;;  %v1654_v31 = vrot.slane %v6190_v7, 2  ;;  %v1835_v58 = vshll.u32 %v6190_v7, 16 }
 0x156   : > { %v1655_v49 = vsel %vm1471_vm6, %v1652_v3, %v1654_v31  ;;  %v1837_v36 = vrot.slane %v1835_v58, 3 }
 0x15b   : > { %4637 = vmatmul.mubr.msk.bf16.gmra.mrb[12].mxu1 %vm559_vm4, %v6107_v30  ;;  %v1653_v30 = vsel %vm1471_vm6, %v1487_v61, %v1652_v3 }
 0x15c   : > { %4640 = vmatprep.mubr.msk.bf16.mxu1 %vm5507_vm1, %v5506_v2 }
 0x163   : > { %4641 = vmatmul.mubr.msk.bf16.gmra.mrb[16].mxu1 %vm559_vm4, %v1484_v48  ;;  %v1796_v48 = vor.u32 %v1795_v41, %v1794_v39  ;;  %v1826_v39 = vshll.u32 %v6183_v32, 16 }
 0x164   : > { %4644 = vmatprep.mubr.msk.bf16.mxu1 %vm5507_vm1, %v5506_v2 }
 0x165   : > { %v1797_v24 = vsel %vm1790_vm8, %v1793_v45, %v1796_v48  ;;  %v1801_v61 = vsel %vm1790_vm8, %v1796_v48, %v1800_v40  ;;  %v1828_v44 = vrot.slane %v1826_v39, 3 }
 0x16b   : > { %4645 = vmatmul.mubr.msk.bf16.gmra.mrb[20].mxu1 %vm559_vm4, %v1486_v0 }
 0x16c   : > { %4648 = vmatprep.mubr.msk.bf16.mxu1 %vm5507_vm1, %v5506_v2 }
 0x173   : > { %4649 = vmatmul.mubr.msk.bf16.gmra.mrb[24].mxu1 %vm559_vm4, %v1488_v9  ;;  %v1806_v9 = vrot.slane %v5725_v56, 2  ;;  %v1811_v56 = vrot.slane %v5772_v16, 3  ;;  %v1816_v16 = vor.u32 %v1815_v14, %v1814_v6  ;;  %v5464_v14 = vld [vmem:[%s5621_s26 + $0x20] sm:$0xff]  }
 0x174   : > { %4652 = vmatprep.mubr.msk.bf16.mxu1 %vm5507_vm1, %v5506_v2 }
 0x175   : > { %v1808_v47 = vor.u32 %v1807_v46, %v1806_v9  ;;  %v1812_v57 = vor.u32 %v1811_v56, %v1810_v22  ;;  %v1821_v42 = vsel %vm1790_vm8, %v1816_v16, %v1820_v28  ;;  %v5462_v46 = vld [vmem:[%s5621_s26 + $0x10] sm:$0xff]  }
 0x177   : > { %v1809_v21 = vsel %vm1790_vm8, %v1804_v19, %v1808_v47  ;;  %v1813_v55 = vsel %vm1790_vm8, %v1808_v47, %v1812_v57  ;;  %v1996_v47 = vrot.slane %v5462_v46, 3 }
 0x17b   : > { %4653 = vmatmul.mubr.msk.bf16.gmra.mrb[28].mxu1 %vm559_vm4, %v1653_v30 }
 0x17c   : > { %4656 = vmatprep.mubr.msk.bf16.mxu1 %vm5507_vm1, %v5506_v2 }
 0x183   : > { %4657 = vmatmul.mubr.msk.bf16.gmra.mrb[32].mxu1 %vm559_vm4, %v1655_v49  ;;  %v1817_v49 = vsel %vm1790_vm8, %v1812_v57, %v1816_v16  ;;  %v1999_v16 = vrot.slane %v5464_v14, 3 }
 0x184   : > { %4662 = vmatprep.mubr.msk.bf16.mxu1 %vm5507_vm1, %v5506_v2 }
 0x185   : > { %v6205_v52 = vpop.f32.mrb[36].mxu0 }
 0x186   : > { %v4436_v54 = vpop.f32.mrb[37].mxu0 }
 0x187   : > { %v6210_v11 = vpop.f32.mrb[38].mxu0 }
 0x188   : > { %v4437_v23 = vpop.f32.mrb[39].mxu0 }
 0x189   : > { %v1829_v23 = vor.u32 %v1828_v44, %v1825_v10 }
 0x18b   : > { %4663 = vmatmul.mubr.msk.bf16.vlgmr.msra.gmra.mrb[0].mxu1 %vm559_vm4, %v1797_v24  ;;  %v1832_v24 = vshrl.u32 %v6190_v7, 16 }
 0x18c   : > { %4666 = vmatprep.mubr.msk.bf16.mxu1 %vm5507_vm1, %v5506_v2  ;;  %4699 = vmatpush3.bf16.msra.mxu1 %v2043_v59 }
 0x18d   : > { %v6219_v60 = vpop.f32.mrb[40].mxu0 }
 0x18e   : > { %v4440_v50 = vpop.f32.mrb[41].mxu0 }
 0x18f   : > { %v6221_v0 = vpop.f32.mrb[42].mxu0 }
 0x190   : > { %v4441_v1 = vpop.f32.mrb[43].mxu0 }
 0x191   : > { %v1830_v1 = vsel %vm1790_vm8, %v1820_v28, %v1829_v23 }
 0x193   : > { %4667 = vmatmul.mubr.msk.bf16.gmra.mrb[4].mxu1 %vm559_vm4, %v1801_v61  ;;  %v1834_v61 = vrot.slane %v1832_v24, 2 }
 0x194   : > { %4670 = vmatprep.mubr.msk.bf16.mxu1 %vm5507_vm1, %v5506_v2 }
 0x195   : > { %v6229_v27 = vpop.f32.mrb[44].mxu0  ;;  %v1838_v37 = vor.u32 %v1837_v36, %v1834_v61 }
 0x196   : > { %v4444_v4 = vpop.f32.mrb[45].mxu0 }
 0x197   : > { %v6231_v33 = vpop.f32.mrb[46].mxu0  ;;  %v1839_v9 = vsel %vm1790_vm8, %v1829_v23, %v1838_v37 }
 0x198   : > { %v4445_v63 = vpop.f32.mrb[47].mxu0 }
 0x19b   : > { %4671 = vmatmul.mubr.msk.bf16.gmra.mrb[8].mxu1 %vm559_vm4, %v1805_v51 }
 0x19c   : > { %4674 = vmatprep.mubr.msk.bf16.mxu1 %vm5507_vm1, %v5506_v2 }
 0x19d   : > { %v6239_v12 = vpop.f32.mrb[48].mxu0 }
 0x19e   : > { %v4448_v13 = vpop.f32.mrb[49].mxu0 }
 0x19f   : > { %v6241_v17 = vpop.f32.mrb[50].mxu0  ;;  %v5463_v13 = vld [vmem:[%s5621_s26 + $0x18] sm:$0xff]  }
 0x1a0   : > { %v4449_v18 = vpop.f32.mrb[51].mxu0 }
 0x1a1   : > { %v1997_v18 = vrot.slane %v5463_v13, 3  ;;  %v2005_v13 = vrot.slane %v5756_v8, 3 }
 0x1a3   : > { %4675 = vmatmul.mubr.msk.bf16.gmra.mrb[12].mxu1 %vm559_vm4, %v1809_v21  ;;  %v1998_v57 = vsel %vm1995_vm10, %v1996_v47, %v1997_v18  ;;  %v2000_v26 = vsel %vm1995_vm10, %v1997_v18, %v1999_v16 }
 0x1a4   : > { %4678 = vmatprep.mubr.msk.bf16.mxu1 %vm5507_vm1, %v5506_v2 }
 0x1a5   : > { %v6249_v25 = vpop.f32.mrb[52].mxu0 }
 0x1a6   : > { %v4452_v29 = vpop.f32.mrb[53].mxu0 }
 0x1a7   : > { %v6251_v62 = vpop.f32.mrb[54].mxu0 }
 0x1a8   : > { %v4453_v5 = vpop.f32.mrb[55].mxu0 }
 0x1ab   : > { %4679 = vmatmul.mubr.msk.bf16.gmra.mrb[16].mxu1 %vm559_vm4, %v1813_v55 }
 0x1ac   : > { %4682 = vmatprep.mubr.msk.bf16.mxu1 %vm5507_vm1, %v5506_v2 }
 0x1ad   : > { %v6259_v20 = vpop.f32.mrb[56].mxu0 }
 0x1ae   : > { %v4456_v3 = vpop.f32.mrb[57].mxu0 }
 0x1af   : > { %v6261_v30 = vpop.f32.mrb[58].mxu0 }
 0x1b0   : > { %v4457_v31 = vpop.f32.mrb[59].mxu0 }
 0x1b3   : > { %4683 = vmatmul.mubr.msk.bf16.gmra.mrb[20].mxu1 %vm559_vm4, %v1817_v49 }
 0x1b4   : > { %4686 = vmatprep.mubr.msk.bf16.mxu1 %vm5507_vm1, %v5506_v2 }
 0x1b5   : > { %v6273_v41 = vpop.f32.mrb[60].mxu0 }
 0x1b6   : > { %v4460_v45 = vpop.f32.mrb[61].mxu0 }
 0x1b7   : > { %v6275_v48 = vpop.f32.mrb[62].mxu0 }
 0x1b8   : > { %v4461_v54 = vpop.f32.mrb[63].mxu0 }
 0x1b9   : > { %v2001_v54 = vrot.slane %v5692_v43, 3 }
 0x1bb   : > { %4687 = vmatmul.mubr.msk.bf16.gmra.mrb[24].mxu1 %vm559_vm4, %v1821_v42  ;;  %v2002_v24 = vsel %vm1995_vm10, %v1999_v16, %v2001_v54 }
 0x1bc   : > { %4690 = vmatprep.mubr.msk.bf16.mxu1 %vm5507_vm1, %v5506_v2 }
 0x1bd   : > { %v6283_v15 = vpop.f32.mrb[64].mxu0 }
 0x1be   : > { %v4464_v59 = vpop.f32.mrb[65].mxu0 }
 0x1bf   : > { %v6285_v40 = vpop.f32.mrb[66].mxu0 }
 0x1c0   : > { %v4465_v50 = vpop.f32.mrb[67].mxu0 }
 0x1c3   : > { %4691 = vmatmul.mubr.msk.bf16.gmra.mrb[28].mxu1 %vm559_vm4, %v1830_v1  ;;  %v2003_v1 = vrot.slane %v5716_v53, 3 }
 0x1c4   : > { %4694 = vmatprep.mubr.msk.bf16.mxu1 %vm5507_vm1, %v5506_v2 }
 0x1c5   : > { %v6291_v19 = vpop.f32.mrb[68].mxu0 }
 0x1c6   : > { %v4468_v4 = vpop.f32.mrb[69].mxu0 }
 0x1c7   : > { %v6293_v63 = vpop.f32.mrb[70].mxu0 }
 0x1c8   : > { %v4469_v51 = vpop.f32.mrb[71].mxu0 }
 0x1c9   : > { %v2004_v51 = vsel %vm1995_vm10, %v2001_v54, %v2003_v1 }
 0x1cb   : > { %4695 = vmatmul.mubr.msk.bf16.gmra.mrb[32].mxu1 %vm559_vm4, %v1839_v9 }
 0x1cc   : > { %4700 = vmatprep.mubr.msk.bf16.mxu1 %vm5507_vm1, %v5506_v2 }
 0x1cf   : > { %v2255_v21 = vpop.f32.mrb[72].mxu0 }
 0x1d0   : > { %v4742_v22 = vpop.f32.mrb[73].mxu0  ;;  %v2327_v56 = vsel %vm2326_vm9, %v2255_v21, -inf  ;;  %v2382_v6 = vsel %vm2381_vm11, %v2255_v21, -inf }
 0x1d1   : > { %2328 = vmax.xlane.f32.xlu0 %v2327_v56  ;;  %v2258_v29 = vpop.f32.mrb[74].mxu0 }
 0x1d2   : > { %v4743_v5 = vpop.f32.mrb[75].mxu0  ;;  %v2330_v55 = vsel %vm2326_vm9, %v2258_v29, -inf  ;;  %v2385_v3 = vsel %vm2381_vm11, %v2258_v29, -inf }
 0x1d3   : > { %4701 = vmatmul.mubr.msk.bf16.vlgmr.msra.gmra.mrb[0].mxu1 %vm559_vm4, %v1998_v57  ;;  %2331 = vmax.xlane.f32.xlu1 %v2330_v55  ;;  %v2006_v57 = vsel %vm1995_vm10, %v2003_v1, %v2005_v13  ;;  %v2613_v1 = vld [vmem:[%s6920_s8] sm:$0x3] }
 0x1d4   : > { %4704 = vmatprep.mubr.msk.bf16.mxu1 %vm5507_vm1, %v5506_v2 }
 0x1d5   : > { %2383 = vmax.xlane.f32.xlu0 %v2382_v6  ;;  %v5465_v6 = vld [vmem:[%s5621_s26 + $0x40] sm:$0xff]   ;;  %s6841_s26 = scalar_lea.vmem %s6921_s9, %s4000_s19 }
 0x1d6   : > { %v2007_v14 = vrot.slane %v5465_v6, 3 }
 0x1d7   : > { %2386 = vmax.xlane.f32.xlu1 %v2385_v3  ;;  %v2263_v31 = vpop.f32.mrb[76].mxu0 }
 0x1d8   : > { %v4746_v49 = vpop.f32.mrb[77].mxu0  ;;  %v2333_v34 = vsel %vm2326_vm9, %v2263_v31, -inf  ;;  %v2388_v39 = vsel %vm2381_vm11, %v2263_v31, -inf }
 0x1d9   : > { %2334 = vmax.xlane.f32.xlu0 %v2333_v34  ;;  %v2266_v28 = vpop.f32.mrb[78].mxu0  ;;  %v2008_v34 = vsel %vm1995_vm10, %v2005_v13, %v2007_v14  ;;  %v2013_v13 = vrot.slane %v6190_v7, 3 }
 0x1da   : > { %v4747_v35 = vpop.f32.mrb[79].mxu0  ;;  %v2336_v45 = vsel %vm2326_vm9, %v2266_v28, -inf  ;;  %v2391_v42 = vsel %vm2381_vm11, %v2266_v28, -inf }
 0x1db   : > { %4705 = vmatmul.mubr.msk.bf16.gmra.mrb[4].mxu1 %vm559_vm4, %v2000_v26  ;;  %2389 = vmax.xlane.f32.xlu1 %v2388_v39 }
 0x1dc   : > { %4708 = vmatprep.mubr.msk.bf16.mxu1 %vm5507_vm1, %v5506_v2 }
 0x1dd   : > { %2337 = vmax.xlane.f32.xlu0 %v2336_v45  ;;  %v2009_v45 = vrot.slane %v5805_v38, 3 }
 0x1df   : > { %2392 = vmax.xlane.f32.xlu1 %v2391_v42  ;;  %v2271_v10 = vpop.f32.mrb[80].mxu0 }
 0x1e0   : > { %v4750_v44 = vpop.f32.mrb[81].mxu0  ;;  %v2339_v23 = vsel %vm2326_vm9, %v2271_v10, -inf  ;;  %v2394_v50 = vsel %vm2381_vm11, %v2271_v10, -inf }
 0x1e1   : > { %2340 = vmax.xlane.f32.xlu0 %v2339_v23  ;;  %v2274_v58 = vpop.f32.mrb[82].mxu0  ;;  %v2010_v23 = vsel %vm1995_vm10, %v2007_v14, %v2009_v45 }
 0x1e2   : > { %v4751_v59 = vpop.f32.mrb[83].mxu0  ;;  %v2342_v43 = vsel %vm2326_vm9, %v2274_v58, -inf  ;;  %v2397_v61 = vsel %vm2381_vm11, %v2274_v58, -inf }
 0x1e3   : > { %4709 = vmatmul.mubr.msk.bf16.gmra.mrb[8].mxu1 %vm559_vm4, %v2002_v24  ;;  %2395 = vmax.xlane.f32.xlu1 %v2394_v50  ;;  %v2011_v50 = vrot.slane %v6183_v32, 3 }
 0x1e4   : > { %4712 = vmatprep.mubr.msk.bf16.mxu1 %vm5507_vm1, %v5506_v2 }
 0x1e5   : > { %2343 = vmax.xlane.f32.xlu0 %v2342_v43 }
 0x1e7   : > { %2398 = vmax.xlane.f32.xlu1 %v2397_v61  ;;  %v2279_v36 = vpop.f32.mrb[84].mxu0 }
 0x1e8   : > { %v4754_v37 = vpop.f32.mrb[85].mxu0  ;;  %v2345_v4 = vsel %vm2326_vm9, %v2279_v36, -inf  ;;  %v2400_v47 = vsel %vm2381_vm11, %v2279_v36, -inf  ;;  %v2670_v36 = vsel %vm587_vm0, %v2613_v1, 0 }
 0x1e9   : > { %2346 = vmax.xlane.f32.xlu0 %v2345_v4  ;;  %v2282_v9 = vpop.f32.mrb[86].mxu0 }
 0x1ea   : > { %v4755_v46 = vpop.f32.mrb[87].mxu0  ;;  %v2348_v53 = vsel %vm2326_vm9, %v2282_v9, -inf  ;;  %v2403_v18 = vsel %vm2381_vm11, %v2282_v9, -inf  ;;  %v6370_v9 = vand.u32 4294901760, %v2670_v36 }
 0x1eb   : > { %4713 = vmatmul.mubr.msk.bf16.gmra.mrb[12].mxu1 %vm559_vm4, %v2004_v51  ;;  %2401 = vmax.xlane.f32.xlu1 %v2400_v47  ;;  %v2012_v51 = vsel %vm1995_vm10, %v2009_v45, %v2011_v50 }
 0x1ec   : > { %4716 = vmatprep.mubr.msk.bf16.mxu1 %vm5507_vm1, %v5506_v2  ;;  %4776 = vmatprep.subr.mxu0 %v6370_v9 }
 0x1ed   : > { %2349 = vmax.xlane.f32.xlu0 %v2348_v53  ;;  %4777 = vmatpush3.msra.mxu0 %v6370_v9 }
 0x1ef   : > { %2404 = vmax.xlane.f32.xlu1 %v2403_v18  ;;  %v2287_v21 = vpop.f32.mrb[88].mxu0 }
 0x1f0   : > { %v4758_v22 = vpop.f32.mrb[89].mxu0  ;;  %v2351_v56 = vsel %vm2326_vm9, %v2287_v21, -inf  ;;  %v2406_v55 = vsel %vm2381_vm11, %v2287_v21, -inf }
 0x1f1   : > { %2352 = vmax.xlane.f32.xlu0 %v2351_v56  ;;  %v2290_v29 = vpop.f32.mrb[90].mxu0 }
 0x1f2   : > { %v4759_v5 = vpop.f32.mrb[91].mxu0  ;;  %v2354_v8 = vsel %vm2326_vm9, %v2290_v29, -inf  ;;  %v2409_v16 = vsel %vm2381_vm11, %v2290_v29, -inf }
 0x1f3   : > { %4717 = vmatmul.mubr.msk.bf16.gmra.mrb[16].mxu1 %vm559_vm4, %v2006_v57  ;;  %2407 = vmax.xlane.f32.xlu1 %v2406_v55  ;;  %v2014_v57 = vsel %vm1995_vm10, %v2011_v50, %v2013_v13 }
 0x1f4   : > { %4720 = vmatprep.mubr.msk.bf16.mxu1 %vm5507_vm1, %v5506_v2 }
 0x1f5   : > { %2355 = vmax.xlane.f32.xlu0 %v2354_v8  ;;  %v6388_v8 = vsub.f32 %v2670_v36, %v6370_v9 }
 0x1f7   : > { %2410 = vmax.xlane.f32.xlu1 %v2409_v16  ;;  %v2295_v3 = vpop.f32.mrb[92].mxu0  ;;  %v6391_v6 = vand.u32 4294901760, %v6388_v8 }
 0x1f8   : > { %v4762_v31 = vpop.f32.mrb[93].mxu0  ;;  %v2357_v49 = vsel %vm2326_vm9, %v2295_v3, -inf  ;;  %v2412_v35 = vsel %vm2381_vm11, %v2295_v3, -inf }
 0x1f9   : > { %2358 = vmax.xlane.f32.xlu0 %v2357_v49  ;;  %v2298_v26 = vpop.f32.mrb[94].mxu0  ;;  %v2922_v14 = vsub.f32 %v6388_v8, %v6391_v6 }
 0x1fa   : > { %v4763_v28 = vpop.f32.mrb[95].mxu0  ;;  %v2360_v39 = vsel %vm2326_vm9, %v2298_v26, -inf  ;;  %v2415_v54 = vsel %vm2381_vm11, %v2298_v26, -inf }
 0x1fb   : > { %4721 = vmatmul.mubr.msk.bf16.gmra.mrb[20].mxu1 %vm559_vm4, %v2008_v34  ;;  %2413 = vmax.xlane.f32.xlu1 %v2412_v35  ;;  %v6395_v16 = vand.u32 4294901760, %v2922_v14  ;;  %v6401_v34 = vld [vmem:[%s6918_s6] ss:$0 sm:$0xff] }
 0x1fc   : > { %4724 = vmatprep.mubr.msk.bf16.mxu1 %vm5507_vm1, %v5506_v2 }
 0x1fd   : > { %2361 = vmax.xlane.f32.xlu0 %v2360_v39  ;;  %4805 = vmatprep.subr.mxu0 %v6395_v16 }
 0x1ff   : > { %2416 = vmax.xlane.f32.xlu1 %v2415_v54  ;;  %v2303_v42 = vpop.f32.mrb[96].mxu0 }
 0x200   : > { %v4766_v10 = vpop.f32.mrb[97].mxu0  ;;  %v2363_v44 = vsel %vm2326_vm9, %v2303_v42, -inf  ;;  %v2418_v59 = vsel %vm2381_vm11, %v2303_v42, -inf }
 0x201   : > { %2364 = vmax.xlane.f32.xlu0 %v2363_v44  ;;  %v2306_v24 = vpop.f32.mrb[98].mxu0 }
 0x202   : > { %v4767_v58 = vpop.f32.mrb[99].mxu0  ;;  %v2366_v38 = vsel %vm2326_vm9, %v2306_v24, -inf  ;;  %v2421_v43 = vsel %vm2381_vm11, %v2306_v24, -inf }
 0x203   : > { %4725 = vmatmul.mubr.msk.bf16.gmra.mrb[24].mxu1 %vm559_vm4, %v2010_v23  ;;  %2419 = vmax.xlane.f32.xlu1 %v2418_v59 }
 0x204   : > { %4728 = vmatprep.mubr.msk.bf16.mxu1 %vm5507_vm1, %v5506_v2 }
 0x205   : > { %2367 = vmax.xlane.f32.xlu0 %v2366_v38 }
 0x207   : > { %2422 = vmax.xlane.f32.xlu1 %v2421_v43  ;;  %v2311_v61 = vpop.f32.mrb[100].mxu0 }
 0x208   : > { %v4770_v37 = vpop.f32.mrb[101].mxu0  ;;  %v2369_v4 = vsel %vm2326_vm9, %v2311_v61, -inf  ;;  %v2424_v47 = vsel %vm2381_vm11, %v2311_v61, -inf }
 0x209   : > { %2370 = vmax.xlane.f32.xlu0 %v2369_v4  ;;  %v2314_v32 = vpop.f32.mrb[102].mxu0 }
 0x20a   : > { %v4771_v46 = vpop.f32.mrb[103].mxu0  ;;  %v2372_v53 = vsel %vm2326_vm9, %v2314_v32, -inf  ;;  %v2427_v18 = vsel %vm2381_vm11, %v2314_v32, -inf }
 0x20b   : > { %4729 = vmatmul.mubr.msk.bf16.gmra.mrb[28].mxu1 %vm559_vm4, %v2012_v51  ;;  %2425 = vmax.xlane.f32.xlu1 %v2424_v47 }
 0x20c   : > { %4732 = vmatprep.mubr.msk.bf16.mxu1 %vm5507_vm1, %v5506_v2 }
 0x20d   : > { %2373 = vmax.xlane.f32.xlu0 %v2372_v53 }
 0x20f   : > { %2428 = vmax.xlane.f32.xlu1 %v2427_v18  ;;  %v2319_v21 = vpop.f32.mrb[104].mxu0 }
 0x210   : > { %v4774_v22 = vpop.f32.mrb[105].mxu0  ;;  %v2375_v56 = vsel %vm2326_vm9, %v2319_v21, -inf  ;;  %v2430_v55 = vsel %vm2381_vm11, %v2319_v21, -inf }
 0x211   : > { %2376 = vmax.xlane.f32.xlu0 %v2375_v56  ;;  %v2322_v29 = vpop.f32.mrb[106].mxu0 }
 0x212   : > { %v4775_v5 = vpop.f32.mrb[107].mxu0  ;;  %v2378_v2 = vsel %vm2326_vm9, %v2322_v29, -inf  ;;  %v2433_v7 = vsel %vm2381_vm11, %v2322_v29, -inf }
 0x213   : > { %4733 = vmatmul.mubr.msk.bf16.gmra.mrb[32].mxu1 %vm559_vm4, %v2014_v57  ;;  %2431 = vmax.xlane.f32.xlu1 %v2430_v55 }
 0x215   : > { %2379 = vmax.xlane.f32.xlu0 %v2378_v2 }
 0x217   : > { %2434 = vmax.xlane.f32.xlu1 %v2433_v7 }
 0x25e   : > { %v2329_v3 = vpop.xlane.xlu0 %2328 }
 0x260   : > { %v2332_v31 = vpop.xlane.xlu1 %2331 }
 0x262   : > { %v2384_v49 = vpop.xlane.xlu0 %2383 }
 0x263   : > { %v2437_v26 = vsel %vm2436_vm12, %v2329_v3, %v2384_v49 }
 0x264   : > { %v2455_v28 = vmul.f32 0.25, %v2437_v26  ;;  %v2387_v35 = vpop.xlane.xlu1 %2386 }
 0x265   : > { %v2438_v39 = vsel %vm2436_vm12, %v2332_v31, %v2387_v35 }
 0x266   : > { %v2480_v45 = vadd.f32 %v6401_v34, %v2455_v28  ;;  %v2456_v54 = vmul.f32 0.25, %v2438_v39  ;;  %v2335_v42 = vpop.xlane.xlu0 %2334 }
 0x268   : > { %v2498_v10 = vsub.f32 0.0, %v2480_v45  ;;  %v2481_v44 = vadd.f32 %v6401_v34, %v2456_v54  ;;  %v2390_v23 = vpop.xlane.xlu1 %2389 }
 0x269   : > { %v2439_v24 = vsel %vm2436_vm12, %v2335_v42, %v2390_v23 }
 0x26a   : > { %v2516_v58 = vmul.f32 1.442695, %v2498_v10  ;;  %v2499_v59 = vsub.f32 0.0, %v2481_v44  ;;  %v2457_v38 = vmul.f32 0.25, %v2439_v24  ;;  %v2338_v50 = vpop.xlane.xlu0 %2337 }
 0x26c   : > { %5390 = vpow2.f32 %v2516_v58  ;;  %v2518_v43 = vmul.f32 1.442695, %v2499_v59  ;;  %v2482_v1 = vadd.f32 %v6401_v34, %v2457_v38  ;;  %v2393_v61 = vpop.xlane.xlu1 %2392 }
 0x26d   : > { %v2440_v36 = vsel %vm2436_vm12, %v2338_v50, %v2393_v61 }
 0x26e   : > { %5392 = vpow2.f32 %v2518_v43  ;;  %v2500_v37 = vsub.f32 0.0, %v2482_v1  ;;  %v2458_v4 = vmul.f32 0.25, %v2440_v36  ;;  %v2341_v51 = vpop.xlane.xlu0 %2340 }
 0x270   : > { %v2520_v32 = vmul.f32 1.442695, %v2500_v37  ;;  %v2483_v46 = vadd.f32 %v6401_v34, %v2458_v4  ;;  %v2396_v47 = vpop.xlane.xlu1 %2395  ;;  %v6422_v37 = vld [vmem:[%s6919_s7] ss:$0 sm:$0xff] }
 0x271   : > { %v2441_v53 = vsel %vm2436_vm12, %v2341_v51, %v2396_v47 }
 0x272   : > { %5394 = vpow2.f32 %v2520_v32  ;;  %v2501_v13 = vsub.f32 0.0, %v2483_v46  ;;  %v2459_v18 = vmul.f32 0.25, %v2441_v53  ;;  %v2344_v21 = vpop.xlane.xlu0 %2343 }
 0x274   : > { %v2522_v22 = vmul.f32 1.442695, %v2501_v13  ;;  %v2484_v56 = vadd.f32 %v6401_v34, %v2459_v18  ;;  %v2399_v57 = vpop.xlane.xlu1 %2398 }
 0x275   : > { %v2442_v29 = vsel %vm2436_vm12, %v2344_v21, %v2399_v57 }
 0x276   : > { %v5391_v5 = vpop.eup %5390  ;;  %5396 = vpow2.f32 %v2522_v22  ;;  %v2502_v55 = vsub.f32 0.0, %v2484_v56  ;;  %v2460_v2 = vmul.f32 0.25, %v2442_v29  ;;  %v2347_v7 = vpop.xlane.xlu0 %2346 }
 0x277   : > { %v2552_v14 = vadd.f32 1.0, %v5391_v5 }
 0x278   : > { %v5393_v3 = vpop.eup %5392  ;;  %v2524_v31 = vmul.f32 1.442695, %v2502_v55  ;;  %v2485_v49 = vadd.f32 %v6401_v34, %v2460_v2  ;;  %v2402_v26 = vpop.xlane.xlu1 %2401 }
 0x279   : > { %5398 = vrcp.f32 %v2552_v14  ;;  %v2553_v28 = vadd.f32 1.0, %v5393_v3  ;;  %v2443_v35 = vsel %vm2436_vm12, %v2347_v7, %v2402_v26 }
 0x27a   : > { %5400 = vpow2.f32 %v2524_v31  ;;  %v2503_v39 = vsub.f32 0.0, %v2485_v49  ;;  %v2461_v45 = vmul.f32 0.25, %v2443_v35  ;;  %v2350_v54 = vpop.xlane.xlu0 %2349 }
 0x27b   : > { %5402 = vrcp.f32 %v2553_v28 }
 0x27c   : > { %v5395_v42 = vpop.eup %5394  ;;  %v2526_v10 = vmul.f32 1.442695, %v2503_v39  ;;  %v2486_v44 = vadd.f32 %v6401_v34, %v2461_v45  ;;  %v2405_v23 = vpop.xlane.xlu1 %2404 }
 0x27d   : > { %v2554_v24 = vadd.f32 1.0, %v5395_v42  ;;  %v2444_v58 = vsel %vm2436_vm12, %v2350_v54, %v2405_v23 }
 0x27e   : > { %5404 = vpow2.f32 %v2526_v10  ;;  %v2504_v59 = vsub.f32 0.0, %v2486_v44  ;;  %v2462_v38 = vmul.f32 0.25, %v2444_v58  ;;  %v2353_v50 = vpop.xlane.xlu0 %2352 }
 0x27f   : > { %5406 = vrcp.f32 %v2554_v24 }
 0x280   : > { %v5397_v43 = vpop.eup %5396  ;;  %v2528_v1 = vmul.f32 1.442695, %v2504_v59  ;;  %v2487_v61 = vadd.f32 %v6401_v34, %v2462_v38  ;;  %v2408_v36 = vpop.xlane.xlu1 %2407 }
 0x281   : > { %v2555_v4 = vadd.f32 1.0, %v5397_v43  ;;  %v2445_v51 = vsel %vm2436_vm12, %v2353_v50, %v2408_v36 }
 0x282   : > { %5408 = vpow2.f32 %v2528_v1  ;;  %v2505_v32 = vsub.f32 0.0, %v2487_v61  ;;  %v2463_v46 = vmul.f32 0.25, %v2445_v51  ;;  %v2356_v47 = vpop.xlane.xlu0 %2355 }
 0x283   : > { %v5399_v53 = vpop.eup %5398  ;;  %5410 = vrcp.f32 %v2555_v4 }
 0x284   : > { %v5401_v13 = vpop.eup %5400  ;;  %v2530_v18 = vmul.f32 1.442695, %v2505_v32  ;;  %v2488_v21 = vadd.f32 %v6401_v34, %v2463_v46  ;;  %v2411_v22 = vpop.xlane.xlu1 %2410  ;;  %v2595_v56 = vmul.f32 %v5399_v53, %v6422_v37 }
 0x285   : > { %v5403_v57 = vpop.eup %5402  ;;  %v2556_v29 = vadd.f32 1.0, %v5401_v13  ;;  %v2446_v5 = vsel %vm2436_vm12, %v2356_v47, %v2411_v22 }
 0x286   : > { %v2596_v55 = vmul.f32 %v5403_v57, %v6422_v37  ;;  %5412 = vpow2.f32 %v2530_v18  ;;  %v2506_v2 = vsub.f32 0.0, %v2488_v21  ;;  %v2464_v7 = vmul.f32 0.25, %v2446_v5  ;;  %v2359_v14 = vpop.xlane.xlu0 %2358 }
 0x287   : > { %5414 = vrcp.f32 %v2556_v29  ;;  %v2616_v3 = vsel %vm2614_vm13, %v2595_v56, 0 }
 0x288   : > { %v5405_v31 = vpop.eup %5404  ;;  %v2532_v49 = vmul.f32 1.442695, %v2506_v2  ;;  %v2489_v26 = vadd.f32 %v6401_v34, %v2464_v7  ;;  %v2414_v28 = vpop.xlane.xlu1 %2413  ;;  %v6431_v35 = vand.u32 4294901760, %v2616_v3  ;;  %v2619_v39 = vsel %vm2614_vm13, %v2596_v55, 0 }
 0x289   : > { %v5407_v45 = vpop.eup %5406  ;;  %v2557_v54 = vadd.f32 1.0, %v5405_v31  ;;  %v2447_v42 = vsel %vm2436_vm12, %v2359_v14, %v2414_v28  ;;  %v6435_v10 = vand.u32 4294901760, %v2619_v39 }
 0x28a   : > { %5416 = vpow2.f32 %v2532_v49  ;;  %v2507_v44 = vsub.f32 0.0, %v2489_v26  ;;  %v2465_v23 = vmul.f32 0.25, %v2447_v42  ;;  %v2362_v24 = vpop.xlane.xlu0 %2361  ;;  %v6438_v58 = vsub.f32 %v2616_v3, %v6431_v35 }
 0x28b   : > { %5418 = vrcp.f32 %v2557_v54  ;;  %v6441_v59 = vsub.f32 %v2619_v39, %v6435_v10  ;;  %v2597_v38 = vmul.f32 %v5407_v45, %v6422_v37 }
 0x28c   : > { %v5409_v50 = vpop.eup %5408  ;;  %v2534_v43 = vmul.f32 1.442695, %v2507_v44  ;;  %v2490_v1 = vadd.f32 %v6401_v34, %v2465_v23  ;;  %v2417_v61 = vpop.xlane.xlu1 %2416  ;;  %v6932_v36 = vand.u32 4294901760, %v6438_v58 }
 0x28d   : > { %v5411_v4 = vpop.eup %5410  ;;  %v2558_v51 = vadd.f32 1.0, %v5409_v50  ;;  %v2448_v32 = vsel %vm2436_vm12, %v2362_v24, %v2417_v61  ;;  %v6931_v46 = vand.u32 4294901760, %v6441_v59  ;;  %v2622_v47 = vsel %vm2614_vm13, %v2597_v38, 0 }
 0x28e   : > { %5420 = vpow2.f32 %v2534_v43  ;;  %v2508_v53 = vsub.f32 0.0, %v2490_v1  ;;  %v2466_v13 = vmul.f32 0.25, %v2448_v32  ;;  %v2365_v18 = vpop.xlane.xlu0 %2364  ;;  %v2741_v21 = vsub.f32 %v6438_v58, %v6932_v36 }
 0x28f   : > { %5422 = vrcp.f32 %v2558_v51  ;;  %v2751_v22 = vsub.f32 %v6441_v59, %v6931_v46  ;;  %v6455_v56 = vand.u32 4294901760, %v2622_v47  ;;  %v2598_v57 = vmul.f32 %v5411_v4, %v6422_v37 }
 0x290   : > { %v5413_v29 = vpop.eup %5412  ;;  %v2536_v5 = vmul.f32 1.442695, %v2508_v53  ;;  %v2491_v55 = vadd.f32 %v6401_v34, %v2466_v13  ;;  %v2420_v2 = vpop.xlane.xlu1 %2419  ;;  %v2742_v7 = vand.u32 4294901760, %v2741_v21 }
 0x291   : > { %v5415_v14 = vpop.eup %5414  ;;  %v2559_v3 = vadd.f32 1.0, %v5413_v29  ;;  %v2449_v31 = vsel %vm2436_vm12, %v2365_v18, %v2420_v2  ;;  %v2752_v49 = vand.u32 4294901760, %v2751_v22  ;;  %v6461_v26 = vsub.f32 %v2622_v47, %v6455_v56 }
 0x292   : > { %5424 = vpow2.f32 %v2536_v5  ;;  %v2509_v28 = vsub.f32 0.0, %v2491_v55  ;;  %v2467_v39 = vmul.f32 0.25, %v2449_v31  ;;  %4778 = vmatprep.mubr.f32.mxu0 %v2742_v7  ;;  %v2368_v45 = vpop.xlane.xlu0 %2367  ;;  %v2625_v54 = vsel %vm2614_vm13, %v2598_v57, 0 }
 0x293   : > { %5426 = vrcp.f32 %v2559_v3  ;;  %4779 = vmatmul.mubr.f32.vlgmr.msra.gmra.mrb[108].mxu0 %v2752_v49  ;;  %v6928_v42 = vand.u32 4294901760, %v6461_v26  ;;  %v6465_v44 = vand.u32 4294901760, %v2625_v54  ;;  %v2599_v23 = vmul.f32 %v5415_v14, %v6422_v37 }
 0x294   : > { %v5417_v24 = vpop.eup %5416  ;;  %v2538_v38 = vmul.f32 1.442695, %v2509_v28  ;;  %v2492_v50 = vadd.f32 %v6401_v34, %v2467_v39  ;;  %v2423_v43 = vpop.xlane.xlu1 %2422  ;;  %4806 = vmatpush3.msra.mxu0 %v6395_v16 }
 0x295   : > { %v5419_v1 = vpop.eup %5418  ;;  %v2560_v61 = vadd.f32 1.0, %v5417_v24  ;;  %v2450_v4 = vsel %vm2436_vm12, %v2368_v45, %v2423_v43  ;;  %v2761_v51 = vsub.f32 %v6461_v26, %v6928_v42  ;;  %v6475_v32 = vsub.f32 %v2625_v54, %v6465_v44  ;;  %4834 = vmatprep.subr.mxu0 %v6388_v8 }
 0x296   : > { %5428 = vpow2.f32 %v2538_v38  ;;  %v2510_v47 = vsub.f32 0.0, %v2492_v50  ;;  %v2468_v53 = vmul.f32 0.25, %v2450_v4  ;;  %v2371_v13 = vpop.xlane.xlu0 %2370  ;;  %v2628_v18 = vsel %vm2614_vm13, %v2599_v23, 0 }
 0x297   : > { %5430 = vrcp.f32 %v2560_v61  ;;  %v2762_v16 = vand.u32 4294901760, %v2761_v51  ;;  %v6925_v21 = vand.u32 4294901760, %v6475_v32  ;;  %v6480_v22 = vand.u32 4294901760, %v2628_v18 }
 0x298   : > { %v5421_v57 = vpop.eup %5420  ;;  %v2540_v29 = vmul.f32 1.442695, %v2510_v47  ;;  %v2493_v5 = vadd.f32 %v6401_v34, %v2468_v53  ;;  %v2426_v55 = vpop.xlane.xlu1 %2425  ;;  %v2600_v2 = vmul.f32 %v5419_v1, %v6422_v37  ;;  %v6500_v47 = vld [vmem:[%s6917_s5] ss:$0 sm:$0xff] }
 0x299   : > { %v5423_v7 = vpop.eup %5422  ;;  %v2561_v14 = vadd.f32 1.0, %v5421_v57  ;;  %4781 = vmatprep.mubr.f32.mxu0 %v2762_v16  ;;  %v2451_v3 = vsel %vm2436_vm12, %v2371_v13, %v2426_v55  ;;  %v2771_v31 = vsub.f32 %v6475_v32, %v6925_v21  ;;  %v6489_v49 = vsub.f32 %v2628_v18, %v6480_v22 }
 0x29a   : > { %5432 = vpow2.f32 %v2540_v29  ;;  %v2511_v28 = vsub.f32 0.0, %v2493_v5  ;;  %v2469_v39 = vmul.f32 0.25, %v2451_v3  ;;  %v2374_v45 = vpop.xlane.xlu0 %2373  ;;  %v2631_v54 = vsel %vm2614_vm13, %v2600_v2, 0 }
 0x29b   : > { %5434 = vrcp.f32 %v2561_v14  ;;  %v2772_v23 = vand.u32 4294901760, %v2771_v31  ;;  %v6924_v24 = vand.u32 4294901760, %v6489_v49  ;;  %v6493_v38 = vand.u32 4294901760, %v2631_v54 }
 0x29c   : > { %v5425_v50 = vpop.eup %5424  ;;  %v2542_v43 = vmul.f32 1.442695, %v2511_v28  ;;  %v2494_v1 = vadd.f32 %v6401_v34, %v2469_v39  ;;  %v2429_v61 = vpop.xlane.xlu1 %2428  ;;  %v2601_v4 = vmul.f32 %v5423_v7, %v6422_v37  ;;  %v4950_v31 = vadd.f32 %v6500_v47, %v6205_v52 }
 0x29d   : > { %v5427_v51 = vpop.eup %5426  ;;  %v2562_v53 = vadd.f32 1.0, %v5425_v50  ;;  %4782 = vmatmul.mubr.f32.gmra.mrb[110].mxu0 %v2772_v23  ;;  %v2452_v13 = vsel %vm2436_vm12, %v2374_v45, %v2429_v61  ;;  %v2781_v18 = vsub.f32 %v6489_v49, %v6924_v24  ;;  %v6507_v16 = vsub.f32 %v2631_v54, %v6493_v38 }
 0x29e   : > { %5436 = vpow2.f32 %v2542_v43  ;;  %v2512_v57 = vsub.f32 0.0, %v2494_v1  ;;  %v2470_v29 = vmul.f32 0.25, %v2452_v13  ;;  %v2377_v5 = vpop.xlane.xlu0 %2376  ;;  %v2634_v55 = vsel %vm2614_vm13, %v2601_v4, 0 }
 0x29f   : > { %5438 = vrcp.f32 %v2562_v53  ;;  %v2782_v2 = vand.u32 4294901760, %v2781_v18  ;;  %v6922_v7 = vand.u32 4294901760, %v6507_v16  ;;  %v6511_v14 = vand.u32 4294901760, %v2634_v55 }
 0x2a0   : > { %v5429_v3 = vpop.eup %5428  ;;  %v2544_v28 = vmul.f32 1.442695, %v2512_v57  ;;  %v2495_v39 = vadd.f32 %v6401_v34, %v2470_v29  ;;  %v2432_v45 = vpop.xlane.xlu1 %2431  ;;  %v2602_v54 = vmul.f32 %v5427_v51, %v6422_v37  ;;  %v4952_v29 = vadd.f32 %v6500_v47, %v6210_v11 }
 0x2a1   : > { %v5431_v23 = vpop.eup %5430  ;;  %v2563_v50 = vadd.f32 1.0, %v5429_v3  ;;  %4784 = vmatprep.mubr.f32.mxu0 %v2782_v2  ;;  %v2453_v43 = vsel %vm2436_vm12, %v2377_v5, %v2432_v45  ;;  %v2791_v1 = vsub.f32 %v6507_v16, %v6922_v7  ;;  %v6522_v61 = vsub.f32 %v2634_v55, %v6511_v14 }
 0x2a2   : > { %5440 = vpow2.f32 %v2544_v28  ;;  %v2513_v52 = vsub.f32 0.0, %v2495_v39  ;;  %v2471_v4 = vmul.f32 0.25, %v2453_v43  ;;  %v2637_v53 = vsel %vm2614_vm13, %v2602_v54, 0  ;;  %v2380_v55 = vpop.xlane.xlu0 %2379 }
 0x2a3   : > { %5442 = vrcp.f32 %v2563_v50  ;;  %v2792_v13 = vand.u32 4294901760, %v2791_v1  ;;  %v6923_v51 = vand.u32 4294901760, %v6522_v61  ;;  %v6526_v18 = vand.u32 4294901760, %v2637_v53 }
 0x2a4   : > { %v5433_v57 = vpop.eup %5432  ;;  %v2546_v5 = vmul.f32 1.442695, %v2513_v52  ;;  %v2496_v2 = vadd.f32 %v6401_v34, %v2471_v4  ;;  %v2435_v3 = vpop.xlane.xlu1 %2434  ;;  %v2603_v28 = vmul.f32 %v5431_v23, %v6422_v37 }
 0x2a5   : > { %v5435_v39 = vpop.eup %5434  ;;  %v2564_v45 = vadd.f32 1.0, %v5433_v57  ;;  %4785 = vmatmul.mubr.f32.gmra.mrb[112].mxu0 %v2792_v13  ;;  %v2454_v54 = vsel %vm2436_vm12, %v2380_v55, %v2435_v3  ;;  %v2801_v50 = vsub.f32 %v6522_v61, %v6923_v51  ;;  %v6537_v43 = vsub.f32 %v2637_v53, %v6526_v18 }
 0x2a6   : > { %5444 = vpow2.f32 %v2546_v5  ;;  %v2514_v11 = vsub.f32 0.0, %v2496_v2  ;;  %v2472_v1 = vmul.f32 0.25, %v2454_v54  ;;  %v2079_v52 = vpop.f32.mrb[0].mxu1  ;;  %v2640_v4 = vsel %vm2614_vm13, %v2603_v28, 0 }
 0x2a7   : > { %5446 = vrcp.f32 %v2564_v45  ;;  %v6540_v23 = vadd.f32 %v4950_v31, %v2079_v52  ;;  %v4702_v57 = vpop.f32.mrb[1].mxu1  ;;  %v2802_v13 = vand.u32 4294901760, %v2801_v50  ;;  %v6927_v55 = vand.u32 4294901760, %v6537_v43 }
 0x2a8   : > { %v5437_v3 = vpop.eup %5436  ;;  %v2548_v7 = vmul.f32 1.442695, %v2514_v11  ;;  %v2497_v51 = vadd.f32 %v6401_v34, %v2472_v1  ;;  %v2082_v24 = vpop.f32.mrb[2].mxu1  ;;  %v6544_v53 = vand.u32 4294901760, %v2640_v4  ;;  %v2604_v5 = vmul.f32 %v5435_v39, %v6422_v37 }
 0x2a9   : > { %v5439_v2 = vpop.eup %5438  ;;  %v2565_v54 = vadd.f32 1.0, %v5437_v3  ;;  %v6547_v21 = vadd.f32 %v4952_v29, %v2082_v24  ;;  %4787 = vmatprep.mubr.f32.mxu0 %v2802_v13  ;;  %v4703_v31 = vpop.f32.mrb[3].mxu1  ;;  %v2811_v28 = vsub.f32 %v6537_v43, %v6927_v55 }
 0x2aa   : > { %5448 = vpow2.f32 %v2548_v7  ;;  %v2515_v45 = vsub.f32 0.0, %v2497_v51  ;;  %v6553_v50 = vsub.f32 %v2640_v4, %v6544_v53  ;;  %v2643_v34 = vsel %vm2614_vm13, %v2604_v5, 0 }
 0x2ab   : > { %5450 = vrcp.f32 %v2565_v54  ;;  %v2812_v11 = vand.u32 4294901760, %v2811_v28  ;;  %v6556_v39 = vand.u32 4294901760, %v2643_v34  ;;  %v2605_v24 = vmul.f32 %v5439_v2, %v6422_v37 }
 0x2ac   : > { %v5441_v29 = vpop.eup %5440  ;;  %v2550_v1 = vmul.f32 1.442695, %v2515_v45  ;;  %v6926_v52 = vand.u32 4294901760, %v6553_v50  ;;  %v4954_v7 = vadd.f32 %v6500_v47, %v6219_v60  ;;  %v4956_v60 = vadd.f32 %v6500_v47, %v6221_v0 }
 0x2ad   : > { %v5443_v57 = vpop.eup %5442  ;;  %v2566_v51 = vadd.f32 1.0, %v5441_v29  ;;  %4788 = vmatmul.mubr.f32.gmra.mrb[114].mxu0 %v2812_v11  ;;  %v6563_v4 = vsub.f32 %v2643_v34, %v6556_v39  ;;  %v2646_v13 = vsel %vm2614_vm13, %v2605_v24, 0 }
 0x2ae   : > { %5452 = vpow2.f32 %v2550_v1  ;;  %v2087_v3 = vpop.f32.mrb[4].mxu1  ;;  %v2821_v5 = vsub.f32 %v6553_v50, %v6926_v52  ;;  %v6569_v2 = vand.u32 4294901760, %v2646_v13  ;;  %v2606_v54 = vmul.f32 %v5443_v57, %v6422_v37 }
 0x2af   : > { %5454 = vrcp.f32 %v2566_v51  ;;  %v6574_v31 = vadd.f32 %v4954_v7, %v2087_v3  ;;  %v4706_v28 = vpop.f32.mrb[5].mxu1  ;;  %v6929_v45 = vand.u32 4294901760, %v6563_v4 }
 0x2b0   : > { %v5445_v34 = vpop.eup %5444  ;;  %v2090_v11 = vpop.f32.mrb[6].mxu1  ;;  %v2822_v24 = vand.u32 4294901760, %v2821_v5  ;;  %v6578_v29 = vsub.f32 %v2646_v13, %v6569_v2  ;;  %v2649_v1 = vsel %vm2614_vm13, %v2606_v54, 0 }
 0x2b1   : > { %6939 = vst [vmem:[#allocation2_spill] sm:$0xff] %v6574_v31  ;;  %v5447_v52 = vpop.eup %5446  ;;  %v2567_v55 = vadd.f32 1.0, %v5445_v34  ;;  %v6581_v57 = vadd.f32 %v4956_v60, %v2090_v11  ;;  %v4707_v42 = vpop.f32.mrb[7].mxu1  ;;  %v2831_v0 = vsub.f32 %v6563_v4, %v6929_v45  ;;  %v6586_v7 = vand.u32 4294901760, %v2649_v1 }
 0x2b2   : > { %4790 = vmatprep.mubr.f32.mxu0 %v2822_v24  ;;  %v6930_v51 = vand.u32 4294901760, %v6578_v29  ;;  %v2607_v3 = vmul.f32 %v5447_v52, %v6422_v37  ;;  %v4958_v34 = vadd.f32 %v6500_v47, %v6229_v27  ;;  %v4960_v24 = vadd.f32 %v6500_v47, %v6231_v33 }
 0x2b3   : > { %6940 = vst [vmem:[#allocation3_spill] sm:$0xff] %v6581_v57  ;;  %5456 = vrcp.f32 %v2567_v55  ;;  %v2832_v13 = vand.u32 4294901760, %v2831_v0  ;;  %v6591_v5 = vsub.f32 %v2649_v1, %v6586_v7 }
 0x2b4   : > { %v5449_v54 = vpop.eup %5448  ;;  %v2841_v42 = vsub.f32 %v6578_v29, %v6930_v51  ;;  %v2652_v60 = vsel %vm2614_vm13, %v2607_v3, 0 }
 0x2b5   : > { %v5451_v28 = vpop.eup %5450  ;;  %v2568_v11 = vadd.f32 1.0, %v5449_v54  ;;  %4791 = vmatmul.mubr.f32.gmra.mrb[116].mxu0 %v2832_v13  ;;  %v6934_v52 = vand.u32 4294901760, %v6591_v5  ;;  %v6600_v55 = vand.u32 4294901760, %v2652_v60 }
 0x2b6   : > { %v2095_v1 = vpop.f32.mrb[8].mxu1  ;;  %v2842_v0 = vand.u32 4294901760, %v2841_v42  ;;  %v2608_v45 = vmul.f32 %v5451_v28, %v6422_v37 }
 0x2b7   : > { %5458 = vrcp.f32 %v2568_v11  ;;  %v6605_v51 = vadd.f32 %v4958_v34, %v2095_v1  ;;  %v4710_v3 = vpop.f32.mrb[9].mxu1  ;;  %v2851_v27 = vsub.f32 %v6591_v5, %v6934_v52  ;;  %v6611_v13 = vsub.f32 %v2652_v60, %v6600_v55 }
 0x2b8   : > { %v5453_v54 = vpop.eup %5452  ;;  %v2098_v46 = vpop.f32.mrb[10].mxu1  ;;  %4793 = vmatprep.mubr.f32.mxu0 %v2842_v0  ;;  %v2655_v33 = vsel %vm2614_vm13, %v2608_v45, 0  ;;  %v4962_v0 = vadd.f32 %v6500_v47, %v6239_v12 }
 0x2b9   : > { %6941 = vst [vmem:[#allocation4_spill] sm:$0xff] %v6605_v51  ;;  %v5455_v36 = vpop.eup %5454  ;;  %v2569_v42 = vadd.f32 1.0, %v5453_v54  ;;  %v6614_v31 = vadd.f32 %v4960_v24, %v2098_v46  ;;  %v4711_v28 = vpop.f32.mrb[11].mxu1  ;;  %v2852_v34 = vand.u32 4294901760, %v2851_v27  ;;  %v6933_v11 = vand.u32 4294901760, %v6611_v13 }
 0x2ba   : > { %v6617_v1 = vand.u32 4294901760, %v2655_v33  ;;  %v2609_v3 = vmul.f32 %v5455_v36, %v6422_v37 }
 0x2bb   : > { %6942 = vst [vmem:[#allocation5_spill] sm:$0xff] %v6614_v31  ;;  %5460 = vrcp.f32 %v2569_v42  ;;  %4794 = vmatmul.mubr.f32.gmra.mrb[118].mxu0 %v2852_v34  ;;  %v2861_v60 = vsub.f32 %v6611_v13, %v6933_v11  ;;  %v4964_v34 = vadd.f32 %v6500_v47, %v6241_v17 }
 0x2bc   : > { %v6624_v45 = vsub.f32 %v2655_v33, %v6617_v1  ;;  %v2658_v46 = vsel %vm2614_vm13, %v2609_v3, 0 }
 0x2bd   : > { %v5457_v24 = vpop.eup %5456  ;;  %v2862_v27 = vand.u32 4294901760, %v2861_v60  ;;  %v6629_v54 = vand.u32 4294901760, %v2658_v46 }
 0x2be   : > { %v2103_v28 = vpop.f32.mrb[12].mxu1  ;;  %v6935_v36 = vand.u32 4294901760, %v6624_v45  ;;  %v2610_v42 = vmul.f32 %v5457_v24, %v6422_v37 }
 0x2bf   : > { %v6635_v11 = vadd.f32 %v4962_v0, %v2103_v28  ;;  %v4714_v33 = vpop.f32.mrb[13].mxu1  ;;  %4796 = vmatprep.mubr.f32.mxu0 %v2862_v27  ;;  %v6638_v3 = vsub.f32 %v2658_v46, %v6629_v54 }
 0x2c0   : > { %v2106_v52 = vpop.f32.mrb[14].mxu1  ;;  %v2871_v12 = vsub.f32 %v6624_v45, %v6935_v36  ;;  %v2661_v60 = vsel %vm2614_vm13, %v2610_v42, 0 }
 0x2c1   : > { %6943 = vst [vmem:[#allocation6_spill] sm:$0xff] %v6635_v11  ;;  %v5459_v51 = vpop.eup %5458  ;;  %v6644_v31 = vadd.f32 %v4964_v34, %v2106_v52  ;;  %v4715_v24 = vpop.f32.mrb[15].mxu1  ;;  %v6936_v17 = vand.u32 4294901760, %v6638_v3  ;;  %v6647_v0 = vand.u32 4294901760, %v2661_v60  ;;  %v4966_v34 = vadd.f32 %v6500_v47, %v6249_v25 }
 0x2c2   : > { %v2872_v28 = vand.u32 4294901760, %v2871_v12  ;;  %v2611_v27 = vmul.f32 %v5459_v51, %v6422_v37 }
 0x2c3   : > { %6944 = vst [vmem:[#allocation7_spill] sm:$0xff] %v6644_v31  ;;  %v2881_v46 = vsub.f32 %v6638_v3, %v6936_v17  ;;  %v6654_v33 = vsub.f32 %v2661_v60, %v6647_v0  ;;  %v4968_v17 = vadd.f32 %v6500_v47, %v6251_v62 }
 0x2c4   : > { %4797 = vmatmul.mubr.f32.gmra.mrb[120].mxu0 %v2872_v28  ;;  %v2664_v42 = vsel %vm2614_vm13, %v2611_v27, 0 }
 0x2c5   : > { %v5461_v52 = vpop.eup %5460  ;;  %v2882_v24 = vand.u32 4294901760, %v2881_v46  ;;  %v6938_v36 = vand.u32 4294901760, %v6654_v33  ;;  %v6660_v12 = vand.u32 4294901760, %v2664_v42 }
 0x2c6   : > { %v2111_v51 = vpop.f32.mrb[16].mxu1  ;;  %v2612_v11 = vmul.f32 %v5461_v52, %v6422_v37 }
 0x2c7   : > { %v6665_v60 = vadd.f32 %v4966_v34, %v2111_v51  ;;  %v4718_v28 = vpop.f32.mrb[17].mxu1  ;;  %4799 = vmatprep.mubr.f32.mxu0 %v2882_v24  ;;  %v2891_v27 = vsub.f32 %v6654_v33, %v6938_v36  ;;  %v6671_v25 = vsub.f32 %v2664_v42, %v6660_v12  ;;  %v4970_v42 = vadd.f32 %v6500_v47, %v6259_v20 }
 0x2c8   : > { %v2114_v46 = vpop.f32.mrb[18].mxu1  ;;  %v2667_v31 = vsel %vm2614_vm13, %v2612_v11, 0 }
 0x2c9   : > { %v6674_v57 = vadd.f32 %v4968_v17, %v2114_v46  ;;  %v4719_v37 = vpop.f32.mrb[19].mxu1  ;;  %v2892_v52 = vand.u32 4294901760, %v2891_v27  ;;  %v6937_v62 = vand.u32 4294901760, %v6671_v25  ;;  %v6677_v34 = vand.u32 4294901760, %v2667_v31 }
 0x2ca   : > { %v4972_v27 = vadd.f32 %v6500_v47, %v6261_v30 }
 0x2cb   : > { %4800 = vmatmul.mubr.f32.gmra.mrb[122].mxu0 %v2892_v52  ;;  %v2901_v24 = vsub.f32 %v6671_v25, %v6937_v62  ;;  %v6683_v51 = vsub.f32 %v2667_v31, %v6677_v34 }
 0x2cd   : > { %v2902_v11 = vand.u32 4294901760, %v2901_v24  ;;  %v2910_v17 = vand.u32 4294901760, %v6683_v51  ;;  %v4974_v24 = vadd.f32 %v6500_v47, %v6273_v41  ;;  %v4978_v41 = vadd.f32 %v6500_v47, %v6283_v15 }
 0x2ce   : > { %v2119_v28 = vpop.f32.mrb[20].mxu1  ;;  %v4982_v15 = vadd.f32 %v6500_v47, %v6291_v19  ;;  %v6945_v19 = vand.u32 4294901760, %v6438_v58 }
 0x2cf   : > { %v6690_v46 = vadd.f32 %v4970_v42, %v2119_v28  ;;  %v4722_v37 = vpop.f32.mrb[21].mxu1  ;;  %4802 = vmatprep.mubr.f32.mxu0 %v2902_v11  ;;  %v2911_v52 = vsub.f32 %v6683_v51, %v2910_v17  ;;  %v4976_v42 = vadd.f32 %v6500_v47, %v6275_v48 }
 0x2d0   : > { %v2122_v31 = vpop.f32.mrb[22].mxu1 }
 0x2d1   : > { %v6695_v62 = vadd.f32 %v4972_v27, %v2122_v31  ;;  %v4723_v36 = vpop.f32.mrb[23].mxu1  ;;  %v2912_v20 = vand.u32 4294901760, %v2911_v52  ;;  %v4980_v52 = vadd.f32 %v6500_v47, %v6285_v40  ;;  %v4984_v40 = vadd.f32 %v6500_v47, %v6293_v63 }
 0x2d2   : > { %v6946_v63 = vand.u32 4294901760, %v6441_v59  ;;  %v6947_v47 = vand.u32 4294901760, %v6461_v26 }
 0x2d3   : > { %4803 = vmatmul.mubr.f32.gmra.mrb[124].mxu0 %v2912_v20 }
 0x2d4   : > { %4807 = vmatprep.mubr.f32.mxu0 %v6431_v35 }
 0x2d6   : > { %v2127_v30 = vpop.f32.mrb[24].mxu1 }
 0x2d7   : > { %v6702_v11 = vadd.f32 %v4974_v24, %v2127_v30  ;;  %v4726_v28 = vpop.f32.mrb[25].mxu1  ;;  %4808 = vmatmul.mubr.f32.vlgmr.msra.gmra.mrb[108].mxu0 %v6435_v10 }
 0x2d8   : > { %v2130_v37 = vpop.f32.mrb[26].mxu1  ;;  %4835 = vmatpush3.msra.mxu0 %v6388_v8  ;;  %4810 = vmatprep.mubr.f32.mxu0 %v6455_v56 }
 0x2d9   : > { %v6707_v36 = vadd.f32 %v4976_v42, %v2130_v37  ;;  %v4727_v27 = vpop.f32.mrb[27].mxu1  ;;  %4863 = vmatprep.subr.mxu0 %v6370_v9 }
 0x2db   : > { %4811 = vmatmul.mubr.f32.gmra.mrb[110].mxu0 %v6465_v44 }
 0x2dc   : > { %4813 = vmatprep.mubr.f32.mxu0 %v6480_v22 }
 0x2de   : > { %v2135_v48 = vpop.f32.mrb[28].mxu1 }
 0x2df   : > { %v6716_v31 = vadd.f32 %v4978_v41, %v2135_v48  ;;  %v4730_v8 = vpop.f32.mrb[29].mxu1  ;;  %4814 = vmatmul.mubr.f32.gmra.mrb[112].mxu0 %v6493_v38 }
 0x2e0   : > { %v2138_v20 = vpop.f32.mrb[30].mxu1  ;;  %4816 = vmatprep.mubr.f32.mxu0 %v6511_v14  ;;  %v6949_v8 = vand.u32 4294901760, %v6489_v49 }
 0x2e1   : > { %v6720_v24 = vadd.f32 %v4980_v52, %v2138_v20  ;;  %v4731_v30 = vpop.f32.mrb[31].mxu1  ;;  %v6948_v52 = vand.u32 4294901760, %v6475_v32  ;;  %v6950_v20 = vand.u32 4294901760, %v6507_v16 }
 0x2e3   : > { %4817 = vmatmul.mubr.f32.gmra.mrb[114].mxu0 %v6526_v18 }
 0x2e4   : > { %4819 = vmatprep.mubr.f32.mxu0 %v6544_v53 }
 0x2e6   : > { %v2143_v42 = vpop.f32.mrb[32].mxu1 }
 0x2e7   : > { %v6728_v28 = vadd.f32 %v4982_v15, %v2143_v42  ;;  %v4734_v37 = vpop.f32.mrb[33].mxu1  ;;  %4820 = vmatmul.mubr.f32.gmra.mrb[116].mxu0 %v6556_v39 }
 0x2e8   : > { %v2146_v27 = vpop.f32.mrb[34].mxu1  ;;  %4822 = vmatprep.mubr.f32.mxu0 %v6569_v2 }
 0x2e9   : > { %v6732_v41 = vadd.f32 %v4984_v40, %v2146_v27  ;;  %v4735_v48 = vpop.f32.mrb[35].mxu1 }
 0x2eb   : > { %4823 = vmatmul.mubr.f32.gmra.mrb[118].mxu0 %v6586_v7 }
 0x2ec   : > { %4825 = vmatprep.mubr.f32.mxu0 %v6600_v55 }
 0x2ef   : > { %4826 = vmatmul.mubr.f32.gmra.mrb[120].mxu0 %v6617_v1 }
 0x2f0   : > { %4828 = vmatprep.mubr.f32.mxu0 %v6629_v54 }
 0x2f3   : > { %4829 = vmatmul.mubr.f32.gmra.mrb[122].mxu0 %v6647_v0 }
 0x2f4   : > { %4831 = vmatprep.mubr.f32.mxu0 %v6660_v12 }
 0x2f7   : > { %4832 = vmatmul.mubr.f32.gmra.mrb[124].mxu0 %v6677_v34 }
 0x2f8   : > { %4836 = vmatprep.mubr.f32.mxu0 %v6438_v58  ;;  %v6951_v58 = vand.u32 4294901760, %v6522_v61 }
 0x2fb   : > { %4837 = vmatmul.mubr.f32.vlgmr.msra.gmra.mrb[108].mxu0 %v6441_v59  ;;  %v6952_v59 = vand.u32 4294901760, %v6537_v43 }
 0x2fc   : > { %4864 = vmatpush3.msra.mxu0 %v6370_v9  ;;  %4839 = vmatprep.mubr.f32.mxu0 %v6461_v26  ;;  %v6954_v26 = vand.u32 4294901760, %v6563_v4 }
 0x2fd   : > { %4892 = vmatprep.subr.mxu0 %v6391_v6 }
 0x2ff   : > { %4840 = vmatmul.mubr.f32.gmra.mrb[110].mxu0 %v6475_v32  ;;  %v6955_v32 = vand.u32 4294901760, %v6578_v29 }
 0x300   : > { %4842 = vmatprep.mubr.f32.mxu0 %v6489_v49  ;;  %v6956_v49 = vand.u32 4294901760, %v6591_v5 }
 0x303   : > { %4843 = vmatmul.mubr.f32.gmra.mrb[112].mxu0 %v6507_v16  ;;  %v6957_v16 = vand.u32 4294901760, %v6611_v13 }
 0x304   : > { %4845 = vmatprep.mubr.f32.mxu0 %v6522_v61  ;;  %v6958_v61 = vand.u32 4294901760, %v6624_v45 }
 0x307   : > { %4846 = vmatmul.mubr.f32.gmra.mrb[114].mxu0 %v6537_v43  ;;  %v6959_v43 = vand.u32 4294901760, %v6638_v3 }
 0x308   : > { %4848 = vmatprep.mubr.f32.mxu0 %v6553_v50 }
 0x30b   : > { %4849 = vmatmul.mubr.f32.gmra.mrb[116].mxu0 %v6563_v4  ;;  %v6961_v4 = vand.u32 4294901760, %v6671_v25 }
 0x30c   : > { %4851 = vmatprep.mubr.f32.mxu0 %v6578_v29  ;;  %v6965_v29 = vld [vmem:[#allocation4_spill] sm:$0xff] }
 0x30f   : > { %4852 = vmatmul.mubr.f32.gmra.mrb[118].mxu0 %v6591_v5 }
 0x310   : > { %4854 = vmatprep.mubr.f32.mxu0 %v6611_v13 }
 0x313   : > { %4855 = vmatmul.mubr.f32.gmra.mrb[120].mxu0 %v6624_v45  ;;  %v6967_v45 = vld [vmem:[#allocation6_spill] sm:$0xff] }
 0x314   : > { %4857 = vmatprep.mubr.f32.mxu0 %v6638_v3 }
 0x317   : > { %4858 = vmatmul.mubr.f32.gmra.mrb[122].mxu0 %v6654_v33 }
 0x318   : > { %4860 = vmatprep.mubr.f32.mxu0 %v6671_v25 }
 0x31b   : > { %4861 = vmatmul.mubr.f32.gmra.mrb[124].mxu0 %v6683_v51 }
 0x31c   : > { %4865 = vmatprep.mubr.f32.mxu0 %v6945_v19 }
 0x31f   : > { %4866 = vmatmul.mubr.f32.vlgmr.msra.gmra.mrb[108].mxu0 %v6946_v63 }
 0x320   : > { %4893 = vmatpush3.msra.mxu0 %v6391_v6  ;;  %4868 = vmatprep.mubr.f32.mxu0 %v6947_v47  ;;  %v6953_v6 = vand.u32 4294901760, %v6553_v50  ;;  %v6960_v50 = vand.u32 4294901760, %v6654_v33 }
 0x321   : > { %4921 = vmatprep.subr.mxu0 %v6370_v9 }
 0x323   : > { %4869 = vmatmul.mubr.f32.gmra.mrb[110].mxu0 %v6948_v52 }
 0x324   : > { %4871 = vmatprep.mubr.f32.mxu0 %v6949_v8 }
 0x327   : > { %4872 = vmatmul.mubr.f32.gmra.mrb[112].mxu0 %v6950_v20 }
 0x328   : > { %4874 = vmatprep.mubr.f32.mxu0 %v6951_v58 }
 0x32b   : > { %4875 = vmatmul.mubr.f32.gmra.mrb[114].mxu0 %v6952_v59 }
 0x32c   : > { %4877 = vmatprep.mubr.f32.mxu0 %v6953_v6 }
 0x32f   : > { %4878 = vmatmul.mubr.f32.gmra.mrb[116].mxu0 %v6954_v26 }
 0x330   : > { %4880 = vmatprep.mubr.f32.mxu0 %v6955_v32 }
 0x333   : > { %4881 = vmatmul.mubr.f32.gmra.mrb[118].mxu0 %v6956_v49 }
 0x334   : > { %4883 = vmatprep.mubr.f32.mxu0 %v6957_v16 }
 0x337   : > { %4884 = vmatmul.mubr.f32.gmra.mrb[120].mxu0 %v6958_v61 }
 0x338   : > { %4886 = vmatprep.mubr.f32.mxu0 %v6959_v43 }
 0x33b   : > { %4887 = vmatmul.mubr.f32.gmra.mrb[122].mxu0 %v6960_v50 }
 0x33c   : > { %4889 = vmatprep.mubr.f32.mxu0 %v6961_v4 }
 0x33f   : > { %4890 = vmatmul.mubr.f32.gmra.mrb[124].mxu0 %v2910_v17 }
 0x340   : > { %4894 = vmatprep.mubr.f32.mxu0 %v6431_v35 }
 0x343   : > { %4895 = vmatmul.mubr.f32.vlgmr.msra.gmra.mrb[108].mxu0 %v6435_v10 }
 0x344   : > { %4922 = vmatpush3.msra.mxu0 %v6370_v9  ;;  %4897 = vmatprep.mubr.f32.mxu0 %v6455_v56 }
 0x347   : > { %4898 = vmatmul.mubr.f32.gmra.mrb[110].mxu0 %v6465_v44 }
 0x348   : > { %4900 = vmatprep.mubr.f32.mxu0 %v6480_v22 }
 0x34b   : > { %4901 = vmatmul.mubr.f32.gmra.mrb[112].mxu0 %v6493_v38 }
 0x34c   : > { %4903 = vmatprep.mubr.f32.mxu0 %v6511_v14 }
 0x34f   : > { %4904 = vmatmul.mubr.f32.gmra.mrb[114].mxu0 %v6526_v18 }
 0x350   : > { %4906 = vmatprep.mubr.f32.mxu0 %v6544_v53 }
 0x353   : > { %4907 = vmatmul.mubr.f32.gmra.mrb[116].mxu0 %v6556_v39 }
 0x354   : > { %4909 = vmatprep.mubr.f32.mxu0 %v6569_v2 }
 0x357   : > { %4910 = vmatmul.mubr.f32.gmra.mrb[118].mxu0 %v6586_v7 }
 0x358   : > { %4912 = vmatprep.mubr.f32.mxu0 %v6600_v55 }
 0x35b   : > { %4913 = vmatmul.mubr.f32.gmra.mrb[120].mxu0 %v6617_v1 }
 0x35c   : > { %4915 = vmatprep.mubr.f32.mxu0 %v6629_v54 }
 0x35f   : > { %4916 = vmatmul.mubr.f32.gmra.mrb[122].mxu0 %v6647_v0 }
 0x360   : > { %4918 = vmatprep.mubr.f32.mxu0 %v6660_v12 }
 0x363   : > { %4919 = vmatmul.mubr.f32.gmra.mrb[124].mxu0 %v6677_v34 }
 0x364   : > { %4923 = vmatprep.mubr.f32.mxu0 %v6431_v35 }
 0x367   : > { %4924 = vmatmul.mubr.f32.vlgmr.msra.gmra.mrb[108].mxu0 %v6435_v10 }
 0x368   : > { %4926 = vmatprep.mubr.f32.mxu0 %v6455_v56 }
 0x36b   : > { %4927 = vmatmul.mubr.f32.gmra.mrb[110].mxu0 %v6465_v44 }
 0x36c   : > { %4929 = vmatprep.mubr.f32.mxu0 %v6480_v22  ;;  %v6962_v22 = vld [vmem:[#allocation3_spill] sm:$0xff] }
 0x36f   : > { %4930 = vmatmul.mubr.f32.gmra.mrb[112].mxu0 %v6493_v38 }
 0x370   : > { %4932 = vmatprep.mubr.f32.mxu0 %v6511_v14 }
 0x373   : > { %4933 = vmatmul.mubr.f32.gmra.mrb[114].mxu0 %v6526_v18  ;;  %v6963_v18 = vld [vmem:[#allocation2_spill] sm:$0xff] }
 0x374   : > { %4935 = vmatprep.mubr.f32.mxu0 %v6544_v53 }
 0x377   : > { %4936 = vmatmul.mubr.f32.gmra.mrb[116].mxu0 %v6556_v39  ;;  %v6964_v39 = vld [vmem:[#allocation5_spill] sm:$0xff] }
 0x378   : > { %4938 = vmatprep.mubr.f32.mxu0 %v6569_v2 }
 0x37b   : > { %4939 = vmatmul.mubr.f32.gmra.mrb[118].mxu0 %v6586_v7 }
 0x37c   : > { %4941 = vmatprep.mubr.f32.mxu0 %v6600_v55  ;;  %v6966_v55 = vld [vmem:[#allocation7_spill] sm:$0xff] }
 0x37f   : > { %4942 = vmatmul.mubr.f32.gmra.mrb[120].mxu0 %v6617_v1 }
 0x380   : > { %4944 = vmatprep.mubr.f32.mxu0 %v6629_v54 }
 0x383   : > { %4945 = vmatmul.mubr.f32.gmra.mrb[122].mxu0 %v6647_v0 }
 0x384   : > { %4947 = vmatprep.mubr.f32.mxu0 %v6660_v12 }
 0x387   : > { %4948 = vmatmul.mubr.f32.gmra.mrb[124].mxu0 %v6677_v34 }
 0x43a   : > { %v4925_v9 = vpop.f32.mrb[108].mxu0 }
 0x43b   : > { %v3850_v35 = vmul.f32 %v6547_v21, %v4925_v9  ;;  %v3743_v10 = vpop.f32.mrb[109].mxu0 }
 0x43c   : > { %v3849_v56 = vmul.f32 %v6540_v23, %v3743_v10 }
 0x43d   : > { %3868 = vst.msk [vmem:[%s6841_s26 + $0x8] sm:$0xff] %vm2193_vm7, %v3850_v35 }
 0x43e   : > { %3867 = vst.msk [vmem:[%s6841_s26] sm:$0xff] %vm2193_vm7, %v3849_v56  ;;  %v4928_v44 = vpop.f32.mrb[110].mxu0 }
 0x43f   : > { %v3852_v38 = vmul.f32 %v6962_v22, %v4928_v44  ;;  %v3755_v14 = vpop.f32.mrb[111].mxu0 }
 0x440   : > { %v3851_v53 = vmul.f32 %v6963_v18, %v3755_v14 }
 0x441   : > { %3870 = vst.msk [vmem:[%s6841_s26 + $0x18] sm:$0xff] %vm2193_vm7, %v3852_v38 }
 0x442   : > { %3869 = vst.msk [vmem:[%s6841_s26 + $0x10] sm:$0xff] %vm2193_vm7, %v3851_v53  ;;  %v4931_v21 = vpop.f32.mrb[112].mxu0 }
 0x443   : > { %v3854_v23 = vmul.f32 %v6964_v39, %v4931_v21  ;;  %v3767_v2 = vpop.f32.mrb[113].mxu0 }
 0x444   : > { %v3853_v7 = vmul.f32 %v6965_v29, %v3767_v2 }
 0x445   : > { %3872 = vst.msk [vmem:[%s6841_s26 + $0x28] sm:$0xff] %vm2193_vm7, %v3854_v23 }
 0x446   : > { %3871 = vst.msk [vmem:[%s6841_s26 + $0x20] sm:$0xff] %vm2193_vm7, %v3853_v7  ;;  %v4934_v5 = vpop.f32.mrb[114].mxu0 }
 0x447   : > { %v3856_v13 = vmul.f32 %v6966_v55, %v4934_v5  ;;  %v3779_v1 = vpop.f32.mrb[115].mxu0 }
 0x448   : > { %v3855_v54 = vmul.f32 %v6967_v45, %v3779_v1 }
 0x449   : > { %3874 = vst.msk [vmem:[%s6841_s26 + $0x38] sm:$0xff] %vm2193_vm7, %v3856_v13 }
 0x44a   : > { %3873 = vst.msk [vmem:[%s6841_s26 + $0x30] sm:$0xff] %vm2193_vm7, %v3855_v54  ;;  %v4937_v3 = vpop.f32.mrb[116].mxu0 }
 0x44b   : > { %v3858_v0 = vmul.f32 %v6674_v57, %v4937_v3  ;;  %v3791_v33 = vpop.f32.mrb[117].mxu0 }
 0x44c   : > { %v3857_v12 = vmul.f32 %v6665_v60, %v3791_v33 }
 0x44d   : > { %3876 = vst.msk [vmem:[%s6841_s26 + $0x48] sm:$0xff] %vm2193_vm7, %v3858_v0 }
 0x44e   : > { %3875 = vst.msk [vmem:[%s6841_s26 + $0x40] sm:$0xff] %vm2193_vm7, %v3857_v12  ;;  %v4940_v25 = vpop.f32.mrb[118].mxu0 }
 0x44f   : > { %v3860_v34 = vmul.f32 %v6695_v62, %v4940_v25  ;;  %v3803_v51 = vpop.f32.mrb[119].mxu0 }
 0x450   : > { %v3859_v17 = vmul.f32 %v6690_v46, %v3803_v51 }
 0x451   : > { %3878 = vst.msk [vmem:[%s6841_s26 + $0x58] sm:$0xff] %vm2193_vm7, %v3860_v34 }
 0x452   : > { %3877 = vst.msk [vmem:[%s6841_s26 + $0x50] sm:$0xff] %vm2193_vm7, %v3859_v17  ;;  %v4943_v57 = vpop.f32.mrb[120].mxu0 }
 0x453   : > { %v3862_v60 = vmul.f32 %v6707_v36, %v4943_v57  ;;  %v3815_v30 = vpop.f32.mrb[121].mxu0 }
 0x454   : > { %v3861_v15 = vmul.f32 %v6702_v11, %v3815_v30 }
 0x455   : > { %3880 = vst.msk [vmem:[%s6841_s26 + $0x68] sm:$0xff] %vm2193_vm7, %v3862_v60 }
 0x456   : > { %3879 = vst.msk [vmem:[%s6841_s26 + $0x60] sm:$0xff] %vm2193_vm7, %v3861_v15  ;;  %v4946_v62 = vpop.f32.mrb[122].mxu0 }
 0x457   : > { %v3864_v42 = vmul.f32 %v6720_v24, %v4946_v62  ;;  %v3827_v46 = vpop.f32.mrb[123].mxu0 }
 0x458   : > { %v3863_v40 = vmul.f32 %v6716_v31, %v3827_v46 }
 0x459   : > { %3882 = vst.msk [vmem:[%s6841_s26 + $0x78] sm:$0xff] %vm2193_vm7, %v3864_v42 }
 0x45a   : > { %3881 = vst.msk [vmem:[%s6841_s26 + $0x70] sm:$0xff] %vm2193_vm7, %v3863_v40  ;;  %v4949_v37 = vpop.f32.mrb[124].mxu0 }
 0x45b   : > { %v3866_v36 = vmul.f32 %v6732_v41, %v4949_v37  ;;  %v3839_v27 = vpop.f32.mrb[125].mxu0 }
 0x45c   : > { %v3865_v11 = vmul.f32 %v6728_v28, %v3839_v27 }
 0x45d   : > { %3884 = vst.msk [vmem:[%s6841_s26 + $0x88] sm:$0xff] %vm2193_vm7, %v3866_v36 }
 0x45e   : > { %3883 = vst.msk [vmem:[%s6841_s26 + $0x80] sm:$0xff] %vm2193_vm7, %v3865_v11 }
 0x45f PF: > { %s19_s13 = sadd.s32 1, %s5504_s13   ;;  %s6968_s30 = smov %s5496_s11 }
 0x460   : > { %p16_p7 = scmp.ge.s32.totalorder %s19_s13, 6   ;;  %s6969_s10 = smov %s5500_s12 }
 0x461   : > { %s6970_s11 = smov %s6973_s14  ;;  %s6971_s12 = smov %s6977_s15 }
 0x462   :  { %18 = sbr.rel (!%p16_p7) target bundleno = 3 (0x3), region = 97 }

</bundles_post_ra>
